<compile_context>
chip_gen: v6e
topology: v6e:2x2x1
jax: 0.10.0
libtpu: 0.0.40
codegen_flags: <defaults>
</compile_context>

<pallas_src>
import functools

import jax
import jax.numpy as jnp
from jax.experimental import pallas as pl
from jax.experimental.pallas import tpu as pltpu

N_CLASSES = 10
IMG_SHAPE = (1, 28, 28)
IMG_DIM = 1 * 28 * 28          # 784
HIDDEN = 512


def _leaky_relu(x, slope=0.2):
    return jnp.where(x > 0, x, slope * x)


def _disc_kernel(ximg_ref, xemb_ref,
                 w1i_ref, w1e_ref, b1_ref,
                 w2_ref, b2_ref,
                 w3_ref, b3_ref,
                 w4_ref, b4_ref,
                 o_ref):
    """One batch tile of the full MLP forward. Weights are VMEM-resident."""
    # ---- Layer 1: (784 + 10) -> 512 as a split matmul (no concat) ------------
    h = jnp.dot(ximg_ref[...], w1i_ref[...], preferred_element_type=jnp.float32)
    h = h + jnp.dot(xemb_ref[...], w1e_ref[...], preferred_element_type=jnp.float32)
    h = _leaky_relu(h + b1_ref[...])

    # ---- Layer 2: 512 -> 512, Dropout(eval)=identity, LeakyReLU --------------
    h = jnp.dot(h.astype(jnp.bfloat16), w2_ref[...],
                preferred_element_type=jnp.float32) + b2_ref[...]
    h = _leaky_relu(h)

    # ---- Layer 3: 512 -> 512, Dropout(eval)=identity, LeakyReLU --------------
    h = jnp.dot(h.astype(jnp.bfloat16), w3_ref[...],
                preferred_element_type=jnp.float32) + b3_ref[...]
    h = _leaky_relu(h)

    # ---- Layer 4: 512 -> 1 as VPU multiply + lane reduction (skip N=1 MXU) ---
    logits = jnp.sum(h * w4_ref[...], axis=-1, keepdims=True) + b4_ref[0, 0]

    # ---- Sigmoid (EUP) --------------------------------------------------------
    o_ref[...] = jax.nn.sigmoid(logits)


@jax.jit
def discriminator_forward(img, labels, params):
    """img: (B, 1, 28, 28) f32 NCHW, labels: (B,) int32.  Returns (B, 1) f32."""
    B = img.shape[0]

    # --- glue (plain JAX): flatten + embedding lookup, cast to bf16 -----------
    img_flat = img.reshape(B, -1).astype(jnp.bfloat16)                # (B, 784)
    emb = jnp.take(params["embedding"], labels, axis=0).astype(jnp.bfloat16)  # (B, 10)

    # --- batch tiling: don't over-tile tiny batches ---------------------------
    if B >= 256:
        tile_b = 256
    elif B >= 128:
        tile_b = 128
    else:
        tile_b = max(8, ((B + 7) // 8) * 8)   # single tile, rounded to sublane

    n_tiles = pl.cdiv(B, tile_b)
    b_pad = n_tiles * tile_b
    if b_pad != B:
        img_flat = jnp.pad(img_flat, ((0, b_pad - B), (0, 0)))
        emb = jnp.pad(emb, ((0, b_pad - B), (0, 0)))

    resident = lambda shape: pl.BlockSpec(shape, lambda i: (0, 0))

    out = pl.pallas_call(
        _disc_kernel,
        out_shape=jax.ShapeDtypeStruct((b_pad, 1), jnp.float32),
        grid=(n_tiles,),
        in_specs=[
            pl.BlockSpec((tile_b, IMG_DIM), lambda i: (i, 0)),     # img tile (bf16)
            pl.BlockSpec((tile_b, N_CLASSES), lambda i: (i, 0)),   # emb tile (bf16)
            resident((IMG_DIM, HIDDEN)),                           # w1_img (bf16)
            resident((N_CLASSES, HIDDEN)),                         # w1_emb (bf16)
            resident((1, HIDDEN)),                                 # b1 (f32)
            resident((HIDDEN, HIDDEN)),                            # w2 (bf16)
            resident((1, HIDDEN)),                                 # b2 (f32)
            resident((HIDDEN, HIDDEN)),                            # w3 (bf16)
            resident((1, HIDDEN)),                                 # b3 (f32)
            resident((1, HIDDEN)),                                 # w4 row (f32)
            pl.BlockSpec(memory_space=pltpu.MemorySpace.SMEM),     # b4 scalar (f32)
        ],
        out_specs=pl.BlockSpec((tile_b, 1), lambda i: (i, 0)),
        compiler_params=pltpu.CompilerParams(
            dimension_semantics=("parallel",)),
    )(
        img_flat, emb,
        params["w1_img"], params["w1_emb"], params["b1"],
        params["w2"], params["b2"],
        params["w3"], params["b3"],
        params["w4"], params["b4"],
    )
    return out[:B]


def init_params(key):
    """Deterministic synthetic parameters matching the PyTorch module's shapes.
    Linear weights stored transposed to (in, out); matmul weights stored bf16."""
    ks = jax.random.split(key, 9)

    def linear(kw, kb, fan_in, fan_out):
        bound = 1.0 / jnp.sqrt(fan_in)
        w = jax.random.uniform(kw, (fan_in, fan_out), jnp.float32, -bound, bound)
        b = jax.random.uniform(kb, (1, fan_out), jnp.float32, -bound, bound)
        return w, b

    w1, b1 = linear(ks[0], ks[1], IMG_DIM + N_CLASSES, HIDDEN)
    w2, b2 = linear(ks[2], ks[3], HIDDEN, HIDDEN)
    w3, b3 = linear(ks[4], ks[5], HIDDEN, HIDDEN)
    w4, b4 = linear(ks[6], ks[7], HIDDEN, 1)
    embedding = jax.random.normal(ks[8], (N_CLASSES, N_CLASSES), jnp.float32)

    return dict(
        embedding=embedding,
        # first layer split: rows [0:784] multiply the image, [784:794] the embedding
        w1_img=w1[:IMG_DIM].astype(jnp.bfloat16),
        w1_emb=w1[IMG_DIM:].astype(jnp.bfloat16),
        b1=b1,
        w2=w2.astype(jnp.bfloat16), b2=b2,
        w3=w3.astype(jnp.bfloat16), b3=b3,
        w4=w4.T.astype(jnp.float32),      # (1, 512) row for the VPU reduction
        b4=b4.astype(jnp.float32),        # (1, 1) scalar, lives in SMEM
    )


def _reference_forward(img, labels, params):
    """Pure-JAX reference with identical dtype handling (bf16 inputs, f32 acc)."""
    B = img.shape[0]
    img_flat = img.reshape(B, -1).astype(jnp.bfloat16)
    emb = jnp.take(params["embedding"], labels, axis=0).astype(jnp.bfloat16)
    h = (jnp.dot(img_flat, params["w1_img"], preferred_element_type=jnp.float32)
         + jnp.dot(emb, params["w1_emb"], preferred_element_type=jnp.float32)
         + params["b1"])
    h = _leaky_relu(h)
    h = jnp.dot(h.astype(jnp.bfloat16), params["w2"],
                preferred_element_type=jnp.float32) + params["b2"]
    h = _leaky_relu(h)
    h = jnp.dot(h.astype(jnp.bfloat16), params["w3"],
                preferred_element_type=jnp.float32) + params["b3"]
    h = _leaky_relu(h)
    logits = jnp.sum(h * params["w4"], axis=-1, keepdims=True) + params["b4"][0, 0]
    return jax.nn.sigmoid(logits)


if __name__ == "__main__":
    key = jax.random.PRNGKey(0)
    k_img, k_lbl, k_par = jax.random.split(key, 3)

    B = 8
    img = jax.random.normal(k_img, (B,) + IMG_SHAPE, jnp.float32)   # (8, 1, 28, 28)
    labels = jax.random.randint(k_lbl, (B,), 0, N_CLASSES, jnp.int32)
    params = init_params(k_par)

    out = discriminator_forward(img, labels, params)
    out = jax.block_until_ready(out)

    ref = _reference_forward(img, labels, params)
    assert out.shape == (B, 1)
    assert jnp.allclose(out, ref, atol=1e-3, rtol=1e-3), (
        f"max abs err {jnp.max(jnp.abs(out - ref))}")

    print("KERNEL_OK")
</pallas_src>

<mosaic_0001>
module attributes {stable_mosaic.version = 11 : i64} {
  func.func @_disc_kernel(%arg0: i32, %arg1: memref<8x784xbf16, #tpu.memory_space<vmem>>, %arg2: memref<8x10xbf16, #tpu.memory_space<vmem>>, %arg3: memref<784x512xbf16, #tpu.memory_space<vmem>>, %arg4: memref<10x512xbf16, #tpu.memory_space<vmem>>, %arg5: memref<1x512xf32, #tpu.memory_space<vmem>>, %arg6: memref<512x512xbf16, #tpu.memory_space<vmem>>, %arg7: memref<1x512xf32, #tpu.memory_space<vmem>>, %arg8: memref<512x512xbf16, #tpu.memory_space<vmem>>, %arg9: memref<1x512xf32, #tpu.memory_space<vmem>>, %arg10: memref<1x512xf32, #tpu.memory_space<vmem>>, %arg11: memref<1x1xf32, #tpu.memory_space<smem>>, %arg12: memref<8x1xf32, #tpu.memory_space<vmem>>) attributes {dimension_semantics = [#tpu.dimension_semantics<parallel>], iteration_bounds = array<i64: 1>, scalar_prefetch = 0 : i64, scratch_operands = 0 : i64, tpu.core_type = #tpu.core_type<tc>, window_params = [{transform_indices = @transform_0, window_bounds = array<i64: 8, 784>}, {transform_indices = @transform_1, window_bounds = array<i64: 8, 10>}, {pipeline_mode = #tpu.pipeline_mode<synchronous>, transform_indices = @transform_2, window_bounds = array<i64: 784, 512>}, {pipeline_mode = #tpu.pipeline_mode<synchronous>, transform_indices = @transform_3, window_bounds = array<i64: 10, 512>}, {pipeline_mode = #tpu.pipeline_mode<synchronous>, transform_indices = @transform_4, window_bounds = array<i64: 1, 512>}, {pipeline_mode = #tpu.pipeline_mode<synchronous>, transform_indices = @transform_5, window_bounds = array<i64: 512, 512>}, {pipeline_mode = #tpu.pipeline_mode<synchronous>, transform_indices = @transform_6, window_bounds = array<i64: 1, 512>}, {pipeline_mode = #tpu.pipeline_mode<synchronous>, transform_indices = @transform_7, window_bounds = array<i64: 512, 512>}, {pipeline_mode = #tpu.pipeline_mode<synchronous>, transform_indices = @transform_8, window_bounds = array<i64: 1, 512>}, {pipeline_mode = #tpu.pipeline_mode<synchronous>, transform_indices = @transform_9, window_bounds = array<i64: 1, 512>}, {transform_indices = @transform_10, window_bounds = array<i64: 1, 1>}, {transform_indices = @transform_11, window_bounds = array<i64: 8, 1>}]} {
    %c0 = arith.constant 0 : index
    %c0_0 = arith.constant 0 : index
    %0 = vector.load %arg1[%c0, %c0_0] : memref<8x784xbf16, #tpu.memory_space<vmem>>, vector<8x784xbf16>
    %c0_1 = arith.constant 0 : index
    %c0_2 = arith.constant 0 : index
    %1 = vector.load %arg3[%c0_1, %c0_2] : memref<784x512xbf16, #tpu.memory_space<vmem>>, vector<784x512xbf16>
    %cst = arith.constant dense<0.000000e+00> : vector<8x512xf32>
    %2 = tpu.matmul %0, %1, %cst {dimension_numbers = #tpu.dot_dimension_numbers<[1], [0], [0], [1], [0, 0, 1, 1], [], []>} : vector<8x784xbf16>, vector<784x512xbf16>, vector<8x512xf32> -> vector<8x512xf32>
    %c0_3 = arith.constant 0 : index
    %c0_4 = arith.constant 0 : index
    %3 = vector.load %arg2[%c0_3, %c0_4] : memref<8x10xbf16, #tpu.memory_space<vmem>>, vector<8x10xbf16>
    %c0_5 = arith.constant 0 : index
    %c0_6 = arith.constant 0 : index
    %4 = vector.load %arg4[%c0_5, %c0_6] : memref<10x512xbf16, #tpu.memory_space<vmem>>, vector<10x512xbf16>
    %cst_7 = arith.constant dense<0.000000e+00> : vector<8x512xf32>
    %5 = tpu.matmul %3, %4, %cst_7 {dimension_numbers = #tpu.dot_dimension_numbers<[1], [0], [0], [1], [0, 0, 1, 1], [], []>} : vector<8x10xbf16>, vector<10x512xbf16>, vector<8x512xf32> -> vector<8x512xf32>
    %6 = arith.addf %2, %5 : vector<8x512xf32>
    %c0_8 = arith.constant 0 : index
    %c0_9 = arith.constant 0 : index
    %7 = vector.load %arg5[%c0_8, %c0_9] : memref<1x512xf32, #tpu.memory_space<vmem>>, vector<1x512xf32>
    %8 = vector.broadcast %7 : vector<1x512xf32> to vector<8x512xf32>
    %9 = arith.addf %6, %8 : vector<8x512xf32>
    %cst_10 = arith.constant 0.000000e+00 : f32
    %10 = vector.broadcast %cst_10 : f32 to vector<8x512xf32>
    %11 = arith.cmpf ogt, %9, %10 : vector<8x512xf32>
    %cst_11 = arith.constant 2.000000e-01 : f32
    %12 = vector.broadcast %cst_11 : f32 to vector<8x512xf32>
    %13 = arith.mulf %12, %9 : vector<8x512xf32>
    %14 = arith.select %11, %9, %13 : vector<8x512xi1>, vector<8x512xf32>
    %15 = arith.truncf %14 : vector<8x512xf32> to vector<8x512xbf16>
    %c0_12 = arith.constant 0 : index
    %c0_13 = arith.constant 0 : index
    %16 = vector.load %arg6[%c0_12, %c0_13] : memref<512x512xbf16, #tpu.memory_space<vmem>>, vector<512x512xbf16>
    %cst_14 = arith.constant dense<0.000000e+00> : vector<8x512xf32>
    %17 = tpu.matmul %15, %16, %cst_14 {dimension_numbers = #tpu.dot_dimension_numbers<[1], [0], [0], [1], [0, 0, 1, 1], [], []>} : vector<8x512xbf16>, vector<512x512xbf16>, vector<8x512xf32> -> vector<8x512xf32>
    %c0_15 = arith.constant 0 : index
    %c0_16 = arith.constant 0 : index
    %18 = vector.load %arg7[%c0_15, %c0_16] : memref<1x512xf32, #tpu.memory_space<vmem>>, vector<1x512xf32>
    %19 = vector.broadcast %18 : vector<1x512xf32> to vector<8x512xf32>
    %20 = arith.addf %17, %19 : vector<8x512xf32>
    %cst_17 = arith.constant 0.000000e+00 : f32
    %21 = vector.broadcast %cst_17 : f32 to vector<8x512xf32>
    %22 = arith.cmpf ogt, %20, %21 : vector<8x512xf32>
    %cst_18 = arith.constant 2.000000e-01 : f32
    %23 = vector.broadcast %cst_18 : f32 to vector<8x512xf32>
    %24 = arith.mulf %23, %20 : vector<8x512xf32>
    %25 = arith.select %22, %20, %24 : vector<8x512xi1>, vector<8x512xf32>
    %26 = arith.truncf %25 : vector<8x512xf32> to vector<8x512xbf16>
    %c0_19 = arith.constant 0 : index
    %c0_20 = arith.constant 0 : index
    %27 = vector.load %arg8[%c0_19, %c0_20] : memref<512x512xbf16, #tpu.memory_space<vmem>>, vector<512x512xbf16>
    %cst_21 = arith.constant dense<0.000000e+00> : vector<8x512xf32>
    %28 = tpu.matmul %26, %27, %cst_21 {dimension_numbers = #tpu.dot_dimension_numbers<[1], [0], [0], [1], [0, 0, 1, 1], [], []>} : vector<8x512xbf16>, vector<512x512xbf16>, vector<8x512xf32> -> vector<8x512xf32>
    %c0_22 = arith.constant 0 : index
    %c0_23 = arith.constant 0 : index
    %29 = vector.load %arg9[%c0_22, %c0_23] : memref<1x512xf32, #tpu.memory_space<vmem>>, vector<1x512xf32>
    %30 = vector.broadcast %29 : vector<1x512xf32> to vector<8x512xf32>
    %31 = arith.addf %28, %30 : vector<8x512xf32>
    %cst_24 = arith.constant 0.000000e+00 : f32
    %32 = vector.broadcast %cst_24 : f32 to vector<8x512xf32>
    %33 = arith.cmpf ogt, %31, %32 : vector<8x512xf32>
    %cst_25 = arith.constant 2.000000e-01 : f32
    %34 = vector.broadcast %cst_25 : f32 to vector<8x512xf32>
    %35 = arith.mulf %34, %31 : vector<8x512xf32>
    %36 = arith.select %33, %31, %35 : vector<8x512xi1>, vector<8x512xf32>
    %c0_26 = arith.constant 0 : index
    %c0_27 = arith.constant 0 : index
    %37 = vector.load %arg10[%c0_26, %c0_27] : memref<1x512xf32, #tpu.memory_space<vmem>>, vector<1x512xf32>
    %38 = vector.broadcast %37 : vector<1x512xf32> to vector<8x512xf32>
    %39 = arith.mulf %36, %38 : vector<8x512xf32>
    %cst_28 = arith.constant dense<0.000000e+00> : vector<8xf32>
    %40 = vector.multi_reduction <add>, %39, %cst_28 [1] : vector<8x512xf32> to vector<8xf32>
    %41 = vector.shape_cast %40 : vector<8xf32> to vector<8x1xf32>
    %c0_29 = arith.constant 0 : index
    %c0_30 = arith.constant 0 : index
    %42 = memref.load %arg11[%c0_29, %c0_30] : memref<1x1xf32, #tpu.memory_space<smem>>
    %43 = vector.broadcast %42 : f32 to vector<8x1xf32>
    %44 = arith.addf %41, %43 : vector<8x1xf32>
    %45 = arith.negf %44 : vector<8x1xf32>
    %46 = math.exp %45 : vector<8x1xf32>
    %cst_31 = arith.constant 1.000000e+00 : f32
    %47 = vector.broadcast %cst_31 : f32 to vector<8x1xf32>
    %48 = arith.addf %47, %46 : vector<8x1xf32>
    %49 = arith.divf %47, %48 : vector<8x1xf32>
    %c0_32 = arith.constant 0 : index
    %c0_33 = arith.constant 0 : index
    %50 = vector.load %arg12[%c0_32, %c0_33] : memref<8x1xf32, #tpu.memory_space<vmem>>, vector<8x1xf32>
    tpu.vector_store %arg12[%c0_32, %c0_33], %49 {strides = array<i32>} : memref<8x1xf32, #tpu.memory_space<vmem>>, vector<8x1xf32>,
    return
  }
  func.func @transform_0(%arg0: i32) -> (i32, i32) {
    %c0_i32 = arith.constant 0 : i32
    %c0_i32_0 = arith.constant 0 : i32
    return %arg0, %c0_i32 : i32, i32
  }
  func.func @transform_1(%arg0: i32) -> (i32, i32) {
    %c0_i32 = arith.constant 0 : i32
    %c0_i32_0 = arith.constant 0 : i32
    return %arg0, %c0_i32 : i32, i32
  }
  func.func @transform_2(%arg0: i32) -> (i32, i32) {
    %c0_i32 = arith.constant 0 : i32
    %c0_i32_0 = arith.constant 0 : i32
    %c0_i32_1 = arith.constant 0 : i32
    return %c0_i32, %c0_i32_0 : i32, i32
  }
  func.func @transform_3(%arg0: i32) -> (i32, i32) {
    %c0_i32 = arith.constant 0 : i32
    %c0_i32_0 = arith.constant 0 : i32
    %c0_i32_1 = arith.constant 0 : i32
    return %c0_i32, %c0_i32_0 : i32, i32
  }
  func.func @transform_4(%arg0: i32) -> (i32, i32) {
    %c0_i32 = arith.constant 0 : i32
    %c0_i32_0 = arith.constant 0 : i32
    %c0_i32_1 = arith.constant 0 : i32
    return %c0_i32, %c0_i32_0 : i32, i32
  }
  func.func @transform_5(%arg0: i32) -> (i32, i32) {
    %c0_i32 = arith.constant 0 : i32
    %c0_i32_0 = arith.constant 0 : i32
    %c0_i32_1 = arith.constant 0 : i32
    return %c0_i32, %c0_i32_0 : i32, i32
  }
  func.func @transform_6(%arg0: i32) -> (i32, i32) {
    %c0_i32 = arith.constant 0 : i32
    %c0_i32_0 = arith.constant 0 : i32
    %c0_i32_1 = arith.constant 0 : i32
    return %c0_i32, %c0_i32_0 : i32, i32
  }
  func.func @transform_7(%arg0: i32) -> (i32, i32) {
    %c0_i32 = arith.constant 0 : i32
    %c0_i32_0 = arith.constant 0 : i32
    %c0_i32_1 = arith.constant 0 : i32
    return %c0_i32, %c0_i32_0 : i32, i32
  }
  func.func @transform_8(%arg0: i32) -> (i32, i32) {
    %c0_i32 = arith.constant 0 : i32
    %c0_i32_0 = arith.constant 0 : i32
    %c0_i32_1 = arith.constant 0 : i32
    return %c0_i32, %c0_i32_0 : i32, i32
  }
  func.func @transform_9(%arg0: i32) -> (i32, i32) {
    %c0_i32 = arith.constant 0 : i32
    %c0_i32_0 = arith.constant 0 : i32
    %c0_i32_1 = arith.constant 0 : i32
    return %c0_i32, %c0_i32_0 : i32, i32
  }
  func.func @transform_10(%arg0: i32) -> (i32, i32) {
    %c0_i32 = arith.constant 0 : i32
    %c0_i32_0 = arith.constant 0 : i32
    %c0_i32_1 = arith.constant 0 : i32
    return %c0_i32, %c0_i32_0 : i32, i32
  }
  func.func @transform_11(%arg0: i32) -> (i32, i32) {
    %c0_i32 = arith.constant 0 : i32
    %c0_i32_0 = arith.constant 0 : i32
    return %arg0, %c0_i32 : i32, i32
  }
}

</mosaic_0001>

<bundles_post_ra>
// kernel: discriminator_forward.1
= control target key start
LH: loop header
LB: loop body
LE: loop exit
PB: predicated region body
PF: predicated region fallthrough
CT: control target
= control target key end

     0   :  { %17 = vsyncpa [#allocation4], 0  ;;  %s5240_s0 = inlined_call_operand.vmem [shape: bf16[8,784], index: 0, kind: input, shape index: {}]   ;;  %s5241_s1 = inlined_call_operand.vmem [shape: bf16[8,10], index: 1, kind: input, shape index: {}]   ;;  %s5242_s2 = inlined_call_operand.hbm [shape: bf16[784,512], index: 2, kind: input, shape index: {}]   ;;  %s5243_s3 = inlined_call_operand.vmem [shape: bf16[10,512], index: 3, kind: input, shape index: {}]   ;;  %s5244_s4 = inlined_call_operand.vmem [shape: f32[1,512], index: 4, kind: input, shape index: {}]   ;;  %s5245_s5 = inlined_call_operand.hbm [shape: bf16[512,512], index: 5, kind: input, shape index: {}]   ;;  %s5246_s6 = inlined_call_operand.vmem [shape: f32[1,512], index: 6, kind: input, shape index: {}]   ;;  %s5247_s7 = inlined_call_operand.hbm [shape: bf16[512,512], index: 7, kind: input, shape index: {}]   ;;  %s5248_s8 = inlined_call_operand.vmem [shape: f32[1,512], index: 8, kind: input, shape index: {}]   ;;  %s5249_s9 = inlined_call_operand.vmem [shape: f32[1,512], index: 9, kind: input, shape index: {}]   ;;  %s5250_s10 = inlined_call_operand.<no memory space> [shape: f32[1,1], index: 10, kind: input, shape index: {}]   ;;  %s5251_s11 = inlined_call_operand.vmem [shape: f32[8,1], index: 11, kind: output, shape index: {}]  }
   0x1   :  { %18 = vsyncpa [#allocation6], 0  ;;  %s4999_s17 = smov [#allocation5]   ;;  %s5000_s19 = smov [#allocation3]  }
   0x2   :  { %s44_s18 = sshll.u32 %s4999_s17, 4  ;;  %s28_s20 = sshll.u32 %s5000_s19, 4  ;;  %s45_s18 = int_to_ptr.vmem [resolvable:$true] %s44_s18  ;;  %s29_s20 = int_to_ptr.vmem [resolvable:$true] %s28_s20 }
   0x3   :  { %s4943_s21 = scalar_lea.vmem %s45_s18, 16384  ;;  %p4948_p1 = scmp.lt.s32.totalorder %s45_s18, %s45_s18 }
   0x4   :  { %p4944_p0 = scmp.ne.s32.totalorder %s45_s18, %s4943_s21  ;;  %p4949_p2 = scmp.lt.s32.totalorder %s4943_s21, %s4943_s21 }
   0x6   :  { %p4950_p3 = por %p4949_p2, %p4948_p1 }
   0x8   :  { %p4951_p4 = pnand %p4950_p3, %p4944_p0 }
   0xa   :  { %4954 = shalt.err (!%p4951_p4)
}
   0xb   :  { %s5001_s22 = smov 256   ;;  %s5002_s23 = smov 16  }
   0xc   :  { %50 = dma.hbm_to_vmem [thread:$0]  %s5245_s5, 16384, %s45_s18, [#allocation6], %s5001_s22, %s5001_s22, %s5002_s23  }
   0xd   :  { %s4963_s26 = scalar_lea.vmem %s29_s20, 25088  ;;  %p4968_p6 = scmp.lt.s32.totalorder %s29_s20, %s29_s20 }
   0xe   :  { %p4964_p5 = scmp.ne.s32.totalorder %s29_s20, %s4963_s26  ;;  %p4969_p7 = scmp.lt.s32.totalorder %s4963_s26, %s4963_s26 }
  0x10   :  { %p4970_p8 = por %p4969_p7, %p4968_p6 }
  0x12   :  { %p4971_p9 = pnand %p4970_p8, %p4964_p5 }
  0x14   :  { %4974 = shalt.err (!%p4971_p9)
}
  0x15   :  { %34 = dma.hbm_to_vmem [thread:$0]  %s5242_s2, 25088, %s29_s20, [#allocation4], %s5001_s22, %s5001_s22, %s5002_s23  }
  0x16   :  { %s5003_s29 = smov [#allocation7]  }
  0x17   :  { %s58_s30 = sshll.u32 %s5003_s29, 4  ;;  %s59_s30 = int_to_ptr.vmem [resolvable:$true] %s58_s30 }
  0x18   :  { %s4983_s12 = scalar_lea.vmem %s59_s30, 16384  ;;  %p4988_p11 = scmp.lt.s32.totalorder %s59_s30, %s59_s30 }
  0x19   :  { %p4984_p10 = scmp.ne.s32.totalorder %s59_s30, %s4983_s12  ;;  %p4989_p12 = scmp.lt.s32.totalorder %s4983_s12, %s4983_s12 }
  0x1b   :  { %p4990_p13 = por %p4989_p12, %p4988_p11 }
  0x1d   :  { %p4991_p0 = pnand %p4990_p13, %p4984_p10 }
  0x1f   :  { %4994 = shalt.err (!%p4991_p0)
}
  0x20   :  { %64 = dma.hbm_to_vmem [thread:$0]  %s5247_s7, 16384, %s59_s30, [#allocation6], %s5001_s22, %s5001_s22, %s5002_s23  }
  0x21   :  { %4995 = dma.done.wait [#allocation4], 25088  }
  0x22   :  { %4996 = vsyncadd [#allocation4], 4294942208 }
  0x23   :  { %4997 = dma.done.wait [#allocation6], 32768  }
  0x24   :  { %4998 = vsyncadd [#allocation6], 4294934528  ;;  %v5004_v0 = vmov 0   ;;  %vm306_vm0 = vcmask 1044480   ;;  %v281_v5 = vld [vmem:[%s5241_s1] sm:$0xf] }
  0x25   :  { %351 = vmatprep.mubr.bf16.mxu0 %v5004_v0  ;;  %392 = vmatprep.mubr.bf16.mxu1 %v5004_v0  ;;  %v4239_v1 = vld [vmem:[%s5243_s3 + $0x4] ss:$16 sps:$4 sm:$0x1f]   ;;  %v4241_v2 = vld [vmem:[%s5243_s3 + $0xc] ss:$16 sps:$4 sm:$0x1f]  }
  0x26   :  { %3767 = vmatprep.subr.msk.bf16.mxu0 %vm306_vm0, %v4239_v1  ;;  %v4243_v3 = vld [vmem:[%s5243_s3] ss:$16 sps:$4 sm:$0x1f]   ;;  %v4244_v4 = vld [vmem:[%s5243_s3 + $0x8] ss:$16 sps:$4 sm:$0x1f]   ;;  %3769 = vmatprep.subr.msk.bf16.mxu1 %vm306_vm0, %v4241_v2 }
  0x27   :  { %v308_v6 = vsel %vm306_vm0, %v4243_v3, 0  ;;  %v314_v7 = vsel %vm306_vm0, %v4244_v4, 0  ;;  %v4245_v8 = vld [vmem:[#allocation3 + $0xe0] ss:$16 sps:$4 sm:$0xff]   ;;  %v4247_v9 = vld [vmem:[#allocation3 + $0xe4] ss:$16 sps:$4 sm:$0xff]  }
  0x28   :  { %334 = vmatpush1.bf16.msra.mxu0 %v308_v6  ;;  %375 = vmatpush1.bf16.msra.mxu1 %v314_v7  ;;  %vm302_vm1 = vcmask 80896   ;;  %v4248_v10 = vld [vmem:[#allocation3 + $0x2e0] ss:$16 sps:$4 sm:$0xff]   ;;  %v4250_v11 = vld [vmem:[#allocation3 + $0x2e4] ss:$16 sps:$4 sm:$0xff]   ;;  %v82_v54 = vld [vmem:[%s5240_s0 + $0x8] sm:$0xff] }
  0x29   :  { %1409 = vmatprep.subr.bf16.mxu0 %v4247_v9  ;;  %v4253_v12 = vld [vmem:[#allocation3 + $0xc4] ss:$16 sps:$4 sm:$0xff]   ;;  %v4251_v13 = vld [vmem:[#allocation3 + $0xc0] ss:$16 sps:$4 sm:$0xff]   ;;  %1450 = vmatprep.subr.bf16.mxu1 %v4250_v11  ;;  %v5099_v57 = vcombine.high %v82_v54, %v82_v54  ;;  %vm1405_vm2 = vcmask 130048   ;;  %vm3755_vm15 = vcmask 7168  }
  0x2a   :  { %v4256_v14 = vld [vmem:[#allocation3 + $0x2c4] ss:$16 sps:$4 sm:$0xff]   ;;  %v4254_v15 = vld [vmem:[#allocation3 + $0x2c0] ss:$16 sps:$4 sm:$0xff]  }
  0x2b   :  { %3768 = vmatmul.mubr.msk.bf16.vlgmr.msra.gmra.mxu0 %vm302_vm1, %v281_v5  ;;  %3770 = vmatmul.mubr.msk.bf16.vlgmr.msra.gmra.mxu1 %vm302_vm1, %v281_v5  ;;  %v4259_v16 = vld [vmem:[#allocation3 + $0xa4] ss:$16 sps:$4 sm:$0xff]   ;;  %v4257_v18 = vld [vmem:[#allocation3 + $0xa0] ss:$16 sps:$4 sm:$0xff]  }
  0x2c   :  { %1410 = vmatpush1.bf16.msra.mxu0 %v4245_v8  ;;  %1451 = vmatpush1.bf16.msra.mxu1 %v4248_v10  ;;  %v4262_v17 = vld [vmem:[#allocation3 + $0x2a4] ss:$16 sps:$4 sm:$0xff]   ;;  %v4260_v19 = vld [vmem:[#allocation3 + $0x2a0] ss:$16 sps:$4 sm:$0xff]  }
  0x2d   :  { %1411 = vmatprep.subr.bf16.mxu0 %v4253_v12  ;;  %1452 = vmatprep.subr.bf16.mxu1 %v4256_v14  ;;  %v4265_v20 = vld [vmem:[#allocation3 + $0x84] ss:$16 sps:$4 sm:$0xff]   ;;  %v4263_v22 = vld [vmem:[#allocation3 + $0x80] ss:$16 sps:$4 sm:$0xff]  }
  0x2e   :  { %v4268_v21 = vld [vmem:[#allocation3 + $0x284] ss:$16 sps:$4 sm:$0xff]   ;;  %v4266_v23 = vld [vmem:[#allocation3 + $0x280] ss:$16 sps:$4 sm:$0xff]   ;;  %1482 = vmatprep.mubr.bf16.mxu1 %v5099_v57 }
  0x2f   :  { %v4271_v24 = vld [vmem:[#allocation3 + $0x64] ss:$16 sps:$4 sm:$0xff]   ;;  %v4269_v26 = vld [vmem:[#allocation3 + $0x60] ss:$16 sps:$4 sm:$0xff]  }
  0x30   :  { %1412 = vmatpush1.bf16.msra.mxu0 %v4251_v13  ;;  %1453 = vmatpush1.bf16.msra.mxu1 %v4254_v15  ;;  %v4274_v25 = vld [vmem:[#allocation3 + $0x264] ss:$16 sps:$4 sm:$0xff]   ;;  %v4272_v27 = vld [vmem:[#allocation3 + $0x260] ss:$16 sps:$4 sm:$0xff]  }
  0x31   :  { %1413 = vmatprep.subr.bf16.mxu0 %v4259_v16  ;;  %1454 = vmatprep.subr.bf16.mxu1 %v4262_v17  ;;  %v4277_v28 = vld [vmem:[#allocation3 + $0x44] ss:$16 sps:$4 sm:$0xff]   ;;  %v4275_v30 = vld [vmem:[#allocation3 + $0x40] ss:$16 sps:$4 sm:$0xff]   ;;  %v5105_v17 = vcombine.low %v82_v54, %v82_v54 }
  0x32   :  { %v4280_v29 = vld [vmem:[#allocation3 + $0x244] ss:$16 sps:$4 sm:$0xff]   ;;  %v4278_v31 = vld [vmem:[#allocation3 + $0x240] ss:$16 sps:$4 sm:$0xff]  }
  0x33   :  { %v4283_v32 = vld [vmem:[#allocation3 + $0x24] ss:$16 sps:$4 sm:$0xff]   ;;  %v4281_v34 = vld [vmem:[#allocation3 + $0x20] ss:$16 sps:$4 sm:$0xff]  }
  0x34   :  { %1414 = vmatpush1.bf16.msra.mxu0 %v4257_v18  ;;  %1455 = vmatpush1.bf16.msra.mxu1 %v4260_v19  ;;  %v4286_v33 = vld [vmem:[#allocation3 + $0x224] ss:$16 sps:$4 sm:$0xff]   ;;  %v4284_v35 = vld [vmem:[#allocation3 + $0x220] ss:$16 sps:$4 sm:$0xff]  }
  0x35   :  { %1415 = vmatprep.subr.bf16.mxu0 %v4265_v20  ;;  %1456 = vmatprep.subr.bf16.mxu1 %v4268_v21  ;;  %v4289_v36 = vld [vmem:[#allocation3 + $0x4] ss:$16 sps:$4 sm:$0xff]   ;;  %v4287_v38 = vld [vmem:[#allocation3] ss:$16 sps:$4 sm:$0xff]   ;;  %v4356_v20 = vld [vmem:[#allocation3 + $0xec] ss:$16 sps:$4 sm:$0xff]  }
  0x36   :  { %v4292_v37 = vld [vmem:[#allocation3 + $0x204] ss:$16 sps:$4 sm:$0xff]   ;;  %v4290_v39 = vld [vmem:[#allocation3 + $0x200] ss:$16 sps:$4 sm:$0xff]  }
  0x37   :  { %v4295_v40 = vld [vmem:[#allocation3 + $0x1e4] ss:$16 sps:$4 sm:$0xff]   ;;  %v4293_v42 = vld [vmem:[#allocation3 + $0x1e0] ss:$16 sps:$4 sm:$0xff]  }
  0x38   :  { %1416 = vmatpush1.bf16.msra.mxu0 %v4263_v22  ;;  %1457 = vmatpush1.bf16.msra.mxu1 %v4266_v23  ;;  %v4298_v41 = vld [vmem:[#allocation3 + $0x3e4] ss:$16 sps:$4 sm:$0xff]   ;;  %v4296_v43 = vld [vmem:[#allocation3 + $0x3e0] ss:$16 sps:$4 sm:$0xff]   ;;  %v4354_v23 = vld [vmem:[#allocation3 + $0xe8] ss:$16 sps:$4 sm:$0xff]  }
  0x39   :  { %1417 = vmatprep.subr.bf16.mxu0 %v4271_v24  ;;  %1458 = vmatprep.subr.bf16.mxu1 %v4274_v25  ;;  %v4301_v44 = vld [vmem:[#allocation3 + $0x1c4] ss:$16 sps:$4 sm:$0xff]   ;;  %v4299_v46 = vld [vmem:[#allocation3 + $0x1c0] ss:$16 sps:$4 sm:$0xff]   ;;  %v4360_v25 = vld [vmem:[%s5240_s0 + $0x18] ss:$0 sps:$4 sm:$0xff]  }
  0x3a   :  { %v4304_v45 = vld [vmem:[#allocation3 + $0x3c4] ss:$16 sps:$4 sm:$0xff]   ;;  %v4302_v47 = vld [vmem:[#allocation3 + $0x3c0] ss:$16 sps:$4 sm:$0xff]  }
  0x3b   :  { %v4307_v48 = vld [vmem:[#allocation3 + $0x1a4] ss:$16 sps:$4 sm:$0xff]   ;;  %v4305_v50 = vld [vmem:[#allocation3 + $0x1a0] ss:$16 sps:$4 sm:$0xff]  }
  0x3c   :  { %1418 = vmatpush1.bf16.msra.mxu0 %v4269_v26  ;;  %1459 = vmatpush1.bf16.msra.mxu1 %v4272_v27  ;;  %v4310_v49 = vld [vmem:[#allocation3 + $0x3a4] ss:$16 sps:$4 sm:$0xff]   ;;  %v4308_v51 = vld [vmem:[#allocation3 + $0x3a0] ss:$16 sps:$4 sm:$0xff]   ;;  %v4363_v27 = vld [vmem:[#allocation3 + $0xcc] ss:$16 sps:$4 sm:$0xff]  }
  0x3d   :  { %1419 = vmatprep.subr.bf16.mxu0 %v4277_v28  ;;  %1460 = vmatprep.subr.bf16.mxu1 %v4280_v29  ;;  %v4313_v52 = vld [vmem:[#allocation3 + $0x184] ss:$16 sps:$4 sm:$0xff]   ;;  %v4311_v58 = vld [vmem:[#allocation3 + $0x180] ss:$16 sps:$4 sm:$0xff]   ;;  %v4361_v28 = vld [vmem:[#allocation3 + $0xc8] ss:$16 sps:$4 sm:$0xff]  }
  0x3e   :  { %v81_v53 = vld [vmem:[%s5240_s0] sm:$0xff] }
  0x3f   :  { %v4316_v55 = vld [vmem:[#allocation3 + $0x384] ss:$16 sps:$4 sm:$0xff]   ;;  %v5097_v56 = vcombine.high %v81_v53, %v81_v53  ;;  %v4314_v59 = vld [vmem:[#allocation3 + $0x380] ss:$16 sps:$4 sm:$0xff]   ;;  %v5103_v15 = vcombine.low %v81_v53, %v81_v53  ;;  %v4399_v53 = vld [vmem:[#allocation3 + $0xc] ss:$16 sps:$4 sm:$0xff]  }
  0x40   :  { %1420 = vmatpush1.bf16.msra.mxu0 %v4275_v30  ;;  %1461 = vmatpush1.bf16.msra.mxu1 %v4278_v31  ;;  %v4319_v60 = vld [vmem:[#allocation3 + $0x164] ss:$16 sps:$4 sm:$0xff]   ;;  %v4317_v62 = vld [vmem:[#allocation3 + $0x160] ss:$16 sps:$4 sm:$0xff]   ;;  %v4369_v31 = vld [vmem:[#allocation3 + $0xac] ss:$16 sps:$4 sm:$0xff]  }
  0x41   :  { %1421 = vmatprep.subr.bf16.mxu0 %v4283_v32  ;;  %1462 = vmatprep.subr.bf16.mxu1 %v4286_v33  ;;  %v4322_v61 = vld [vmem:[#allocation3 + $0x364] ss:$16 sps:$4 sm:$0xff]   ;;  %v4320_v63 = vld [vmem:[#allocation3 + $0x360] ss:$16 sps:$4 sm:$0xff]   ;;  %v4367_v32 = vld [vmem:[#allocation3 + $0xa8] ss:$16 sps:$4 sm:$0xff]  }
  0x42   :  { %1441 = vmatprep.mubr.bf16.mxu0 %v5097_v56  ;;  %v4325_v1 = vld [vmem:[#allocation3 + $0x144] ss:$16 sps:$4 sm:$0xff]   ;;  %v4323_v3 = vld [vmem:[#allocation3 + $0x140] ss:$16 sps:$4 sm:$0xff]  }
  0x43   :  { %v4328_v2 = vld [vmem:[#allocation3 + $0x344] ss:$16 sps:$4 sm:$0xff]   ;;  %v4326_v4 = vld [vmem:[#allocation3 + $0x340] ss:$16 sps:$4 sm:$0xff]  }
  0x44   :  { %1422 = vmatpush1.bf16.msra.mxu0 %v4281_v34  ;;  %1463 = vmatpush1.bf16.msra.mxu1 %v4284_v35  ;;  %v4331_v5 = vld [vmem:[#allocation3 + $0x124] ss:$16 sps:$4 sm:$0xff]   ;;  %v4329_v7 = vld [vmem:[#allocation3 + $0x120] ss:$16 sps:$4 sm:$0xff]   ;;  %v4375_v35 = vld [vmem:[#allocation3 + $0x8c] ss:$16 sps:$4 sm:$0xff]  }
  0x45   :  { %1423 = vmatprep.subr.bf16.mxu0 %v4289_v36  ;;  %1464 = vmatprep.subr.bf16.mxu1 %v4292_v37  ;;  %v4334_v6 = vld [vmem:[#allocation3 + $0x324] ss:$16 sps:$4 sm:$0xff]   ;;  %v4332_v8 = vld [vmem:[#allocation3 + $0x320] ss:$16 sps:$4 sm:$0xff]  }
  0x46   :  { %v4337_v9 = vld [vmem:[#allocation3 + $0x104] ss:$16 sps:$4 sm:$0xff]   ;;  %v4335_v11 = vld [vmem:[#allocation3 + $0x100] ss:$16 sps:$4 sm:$0xff]  }
  0x47   :  { %v4340_v10 = vld [vmem:[#allocation3 + $0x304] ss:$16 sps:$4 sm:$0xff]   ;;  %v4338_v12 = vld [vmem:[#allocation3 + $0x300] ss:$16 sps:$4 sm:$0xff]  }
  0x48   :  { %1424 = vmatpush1.bf16.msra.mxu0 %v4287_v38  ;;  %1465 = vmatpush1.bf16.msra.mxu1 %v4290_v39  ;;  %v4347_v13 = vld [vmem:[#allocation3 + $0x4e4] ss:$16 sps:$4 sm:$0xff]   ;;  %v4345_v16 = vld [vmem:[#allocation3 + $0x4e0] ss:$16 sps:$4 sm:$0xff]   ;;  %v4373_v38 = vld [vmem:[#allocation3 + $0x88] ss:$16 sps:$4 sm:$0xff]  }
  0x49   :  { %1425 = vmatprep.subr.bf16.mxu0 %v4295_v40  ;;  %1466 = vmatprep.subr.bf16.mxu1 %v4298_v41  ;;  %v4350_v14 = vld [vmem:[#allocation3 + $0x604] ss:$16 sps:$4 sm:$0xff]   ;;  %v4348_v18 = vld [vmem:[#allocation3 + $0x600] ss:$16 sps:$4 sm:$0xff]   ;;  %v4381_v41 = vld [vmem:[#allocation3 + $0x6c] ss:$16 sps:$4 sm:$0xff]  }
  0x4a   :  { %v4353_v19 = vld [vmem:[#allocation3 + $0x4c4] ss:$16 sps:$4 sm:$0xff]   ;;  %v4351_v21 = vld [vmem:[#allocation3 + $0x4c0] ss:$16 sps:$4 sm:$0xff]  }
  0x4b   :  { %v4359_v22 = vld [vmem:[#allocation3 + $0x4a4] ss:$16 sps:$4 sm:$0xff]   ;;  %v4357_v24 = vld [vmem:[#allocation3 + $0x4a0] ss:$16 sps:$4 sm:$0xff]  }
  0x4c   :  { %1426 = vmatpush2.bf16.msra.mxu0 %v4293_v42  ;;  %1467 = vmatpush2.bf16.msra.mxu1 %v4296_v43  ;;  %v4366_v26 = vld [vmem:[#allocation3 + $0x484] ss:$16 sps:$4 sm:$0xff]   ;;  %v4364_v29 = vld [vmem:[#allocation3 + $0x480] ss:$16 sps:$4 sm:$0xff]   ;;  %v4379_v43 = vld [vmem:[#allocation3 + $0x68] ss:$16 sps:$4 sm:$0xff]  }
  0x4d   :  { %1427 = vmatprep.subr.bf16.mxu0 %v4301_v44  ;;  %1468 = vmatprep.subr.bf16.mxu1 %v4304_v45  ;;  %v4372_v30 = vld [vmem:[#allocation3 + $0x464] ss:$16 sps:$4 sm:$0xff]   ;;  %v4370_v33 = vld [vmem:[#allocation3 + $0x460] ss:$16 sps:$4 sm:$0xff]   ;;  %v4387_v45 = vld [vmem:[#allocation3 + $0x4c] ss:$16 sps:$4 sm:$0xff]  }
  0x4e   :  { %v4378_v34 = vld [vmem:[#allocation3 + $0x444] ss:$16 sps:$4 sm:$0xff]   ;;  %v4376_v36 = vld [vmem:[#allocation3 + $0x440] ss:$16 sps:$4 sm:$0xff]  }
  0x4f   :  { %v5118_v37 = vld [vmem:[%s5240_s0 + $0x10] sm:$0xff] }
  0x50   :  { %1428 = vmatpush2.bf16.msra.mxu0 %v4299_v46  ;;  %1469 = vmatpush2.bf16.msra.mxu1 %v4302_v47  ;;  %v4384_v39 = vld [vmem:[#allocation3 + $0x424] ss:$16 sps:$4 sm:$0xff]   ;;  %v5122_v40 = vcombine.high %v5118_v37, %v5118_v37  ;;  %v4382_v42 = vld [vmem:[#allocation3 + $0x420] ss:$16 sps:$4 sm:$0xff]   ;;  %v4385_v47 = vld [vmem:[#allocation3 + $0x48] ss:$16 sps:$4 sm:$0xff]  }
  0x51   :  { %1429 = vmatprep.subr.bf16.mxu0 %v4307_v48  ;;  %1470 = vmatprep.subr.bf16.mxu1 %v4310_v49  ;;  %v4390_v44 = vld [vmem:[#allocation3 + $0x404] ss:$16 sps:$4 sm:$0xff]   ;;  %v4388_v46 = vld [vmem:[#allocation3 + $0x400] ss:$16 sps:$4 sm:$0xff]   ;;  %v4393_v49 = vld [vmem:[#allocation3 + $0x2c] ss:$16 sps:$4 sm:$0xff]  }
  0x52   :  { %v4396_v48 = vld [vmem:[#allocation3 + $0x5e4] ss:$16 sps:$4 sm:$0xff]   ;;  %v4400_v54 = vld [vmem:[#allocation3 + $0x5c0] ss:$16 sps:$4 sm:$0xff]  }
  0x54   :  { %1430 = vmatpush2.bf16.msra.mxu0 %v4305_v50  ;;  %1471 = vmatpush2.bf16.msra.mxu1 %v4308_v51  ;;  %v4394_v50 = vld [vmem:[#allocation3 + $0x5e0] ss:$16 sps:$4 sm:$0xff]   ;;  %v4391_v51 = vld [vmem:[#allocation3 + $0x28] ss:$16 sps:$4 sm:$0xff]  }
  0x55   :  { %1431 = vmatprep.subr.bf16.mxu0 %v4313_v52  ;;  %1472 = vmatprep.subr.bf16.mxu1 %v4316_v55  ;;  %v4402_v52 = vld [vmem:[#allocation3 + $0x5c4] ss:$16 sps:$4 sm:$0xff]   ;;  %v4397_v55 = vld [vmem:[#allocation3 + $0x8] ss:$16 sps:$4 sm:$0xff]  }
  0x58   :  { %1432 = vmatpush2.bf16.msra.mxu0 %v4311_v58  ;;  %1473 = vmatpush2.bf16.msra.mxu1 %v4314_v59  ;;  %v4405_v58 = vld [vmem:[#allocation3 + $0x1ec] ss:$16 sps:$4 sm:$0xff]   ;;  %v4406_v59 = vld [vmem:[#allocation3 + $0x5a0] ss:$16 sps:$4 sm:$0xff]  }
  0x59   :  { %1433 = vmatprep.subr.bf16.mxu0 %v4319_v60  ;;  %1474 = vmatprep.subr.bf16.mxu1 %v4322_v61  ;;  %v4403_v60 = vld [vmem:[#allocation3 + $0x1e8] ss:$16 sps:$4 sm:$0xff]   ;;  %v4414_v61 = vld [vmem:[#allocation3 + $0x584] ss:$16 sps:$4 sm:$0xff]  }
  0x5c   :  { %1434 = vmatpush2.bf16.msra.mxu0 %v4317_v62  ;;  %1475 = vmatpush2.bf16.msra.mxu1 %v4320_v63  ;;  %v4411_v62 = vld [vmem:[#allocation3 + $0x1cc] ss:$16 sps:$4 sm:$0xff]   ;;  %v4412_v63 = vld [vmem:[#allocation3 + $0x580] ss:$16 sps:$4 sm:$0xff]  }
  0x5d   :  { %1435 = vmatprep.subr.bf16.mxu0 %v4325_v1  ;;  %1476 = vmatprep.subr.bf16.mxu1 %v4328_v2  ;;  %v4409_v1 = vld [vmem:[#allocation3 + $0x1c8] ss:$16 sps:$4 sm:$0xff]   ;;  %v4420_v2 = vld [vmem:[#allocation3 + $0x564] ss:$16 sps:$4 sm:$0xff]  }
  0x60   :  { %1436 = vmatpush2.bf16.msra.mxu0 %v4323_v3  ;;  %1477 = vmatpush2.bf16.msra.mxu1 %v4326_v4  ;;  %v4417_v3 = vld [vmem:[#allocation3 + $0x1ac] ss:$16 sps:$4 sm:$0xff]   ;;  %v4418_v4 = vld [vmem:[#allocation3 + $0x560] ss:$16 sps:$4 sm:$0xff]  }
  0x61   :  { %1437 = vmatprep.subr.bf16.mxu0 %v4331_v5  ;;  %1478 = vmatprep.subr.bf16.mxu1 %v4334_v6  ;;  %v4415_v5 = vld [vmem:[#allocation3 + $0x1a8] ss:$16 sps:$4 sm:$0xff]   ;;  %v4426_v6 = vld [vmem:[#allocation3 + $0x544] ss:$16 sps:$4 sm:$0xff]  }
  0x64   :  { %1438 = vmatpush2.bf16.msra.mxu0 %v4329_v7  ;;  %1479 = vmatpush2.bf16.msra.mxu1 %v4332_v8  ;;  %v4423_v7 = vld [vmem:[#allocation3 + $0x18c] ss:$16 sps:$4 sm:$0xff]   ;;  %v4424_v8 = vld [vmem:[#allocation3 + $0x540] ss:$16 sps:$4 sm:$0xff]  }
  0x65   :  { %1439 = vmatprep.subr.bf16.mxu0 %v4337_v9  ;;  %1480 = vmatprep.subr.bf16.mxu1 %v4340_v10  ;;  %v4421_v9 = vld [vmem:[#allocation3 + $0x188] ss:$16 sps:$4 sm:$0xff]   ;;  %v4432_v10 = vld [vmem:[#allocation3 + $0x524] ss:$16 sps:$4 sm:$0xff]  }
  0x68   :  { %1440 = vmatpush2.bf16.msra.mxu0 %v4335_v11  ;;  %1481 = vmatpush2.bf16.msra.mxu1 %v4338_v12  ;;  %v4429_v11 = vld [vmem:[#allocation3 + $0x16c] ss:$16 sps:$4 sm:$0xff]   ;;  %v4430_v12 = vld [vmem:[#allocation3 + $0x520] ss:$16 sps:$4 sm:$0xff]  }
  0x69   :  { %1491 = vmatprep.subr.bf16.mxu0 %v4347_v13  ;;  %1546 = vmatprep.subr.bf16.mxu1 %v4350_v14  ;;  %v4427_v13 = vld [vmem:[#allocation3 + $0x168] ss:$16 sps:$4 sm:$0xff]   ;;  %v4438_v14 = vld [vmem:[#allocation3 + $0x504] ss:$16 sps:$4 sm:$0xff]  }
  0x6b   :  { %1442 = vmatmul.mubr.bf16.vlgmr.msra.gmra.mxu0 %v5103_v15  ;;  %1483 = vmatmul.mubr.bf16.vlgmr.msra.gmra.mxu1 %v5105_v17 }
  0x6c   :  { %1492 = vmatpush1.bf16.msra.mxu0 %v4345_v16  ;;  %1547 = vmatpush1.bf16.msra.mxu1 %v4348_v18  ;;  %v4435_v16 = vld [vmem:[#allocation3 + $0x14c] ss:$16 sps:$4 sm:$0xff]   ;;  %v4436_v18 = vld [vmem:[#allocation3 + $0x500] ss:$16 sps:$4 sm:$0xff]  }
  0x6d   :  { %1493 = vmatprep.subr.bf16.mxu0 %v4353_v19  ;;  %1564 = vmatprep.mubr.bf16.mxu1 %v5004_v0  ;;  %v4433_v19 = vld [vmem:[#allocation3 + $0x148] ss:$16 sps:$4 sm:$0xff]  }
  0x6e   :  { %1573 = vmatprep.subr.bf16.mxu1 %v4356_v20  ;;  %1523 = vmatprep.mubr.bf16.mxu0 %v5122_v40  ;;  %v4446_v20 = vld [vmem:[#allocation3 + $0x2ec] ss:$16 sps:$4 sm:$0xff]  }
  0x70   :  { %1494 = vmatpush1.bf16.msra.mxu0 %v4351_v21  ;;  %v4443_v21 = vld [vmem:[#allocation3 + $0x12c] ss:$16 sps:$4 sm:$0xff]  }
  0x71   :  { %1495 = vmatprep.subr.bf16.mxu0 %v4359_v22  ;;  %v5127_v22 = vcombine.low %v5118_v37, %v5118_v37  ;;  %v4470_v37 = vld [vmem:[#allocation3 + $0x26c] ss:$16 sps:$4 sm:$0xff]  }
  0x73   :  { %3974 = vmatmul.mubr.msk.bf16.vlgmr.msra.gmra.mxu1 %vm1405_vm2, %v4360_v25  ;;  %v4452_v25 = vld [vmem:[#allocation3 + $0x2cc] ss:$16 sps:$4 sm:$0xff]  }
  0x74   :  { %1496 = vmatpush1.bf16.msra.mxu0 %v4357_v24  ;;  %1574 = vmatpush1.bf16.msra.mxu1 %v4354_v23  ;;  %v4444_v23 = vld [vmem:[#allocation3 + $0x2e8] ss:$16 sps:$4 sm:$0xff]  }
  0x75   :  { %1497 = vmatprep.subr.bf16.mxu0 %v4366_v26  ;;  %1575 = vmatprep.subr.bf16.mxu1 %v4363_v27  ;;  %v4441_v24 = vld [vmem:[#allocation3 + $0x128] ss:$16 sps:$4 sm:$0xff]   ;;  %v4449_v26 = vld [vmem:[#allocation3 + $0x10c] ss:$16 sps:$4 sm:$0xff]  }
  0x76   :  { %1605 = vmatprep.mubr.bf16.mxu1 %v5097_v56  ;;  %v4408_v56 = vld [vmem:[#allocation3 + $0x5a4] ss:$16 sps:$4 sm:$0xff]   ;;  %v4450_v27 = vld [vmem:[#allocation3 + $0x2c8] ss:$16 sps:$4 sm:$0xff]  }
  0x78   :  { %1498 = vmatpush1.bf16.msra.mxu0 %v4364_v29  ;;  %1576 = vmatpush1.bf16.msra.mxu1 %v4361_v28  ;;  %v4447_v28 = vld [vmem:[#allocation3 + $0x108] ss:$16 sps:$4 sm:$0xff]   ;;  %v4458_v29 = vld [vmem:[#allocation3 + $0x2ac] ss:$16 sps:$4 sm:$0xff]  }
  0x79   :  { %1499 = vmatprep.subr.bf16.mxu0 %v4372_v30  ;;  %1577 = vmatprep.subr.bf16.mxu1 %v4369_v31  ;;  %v4455_v30 = vld [vmem:[#allocation3 + $0x4ec] ss:$16 sps:$4 sm:$0xff]   ;;  %v4456_v31 = vld [vmem:[#allocation3 + $0x2a8] ss:$16 sps:$4 sm:$0xff]  }
  0x7c   :  { %1500 = vmatpush1.bf16.msra.mxu0 %v4370_v33  ;;  %1578 = vmatpush1.bf16.msra.mxu1 %v4367_v32  ;;  %v4453_v32 = vld [vmem:[#allocation3 + $0x4e8] ss:$16 sps:$4 sm:$0xff]   ;;  %v4464_v33 = vld [vmem:[#allocation3 + $0x28c] ss:$16 sps:$4 sm:$0xff]  }
  0x7d   :  { %1501 = vmatprep.subr.bf16.mxu0 %v4378_v34  ;;  %1579 = vmatprep.subr.bf16.mxu1 %v4375_v35  ;;  %v4461_v34 = vld [vmem:[#allocation3 + $0x4cc] ss:$16 sps:$4 sm:$0xff]   ;;  %v4462_v35 = vld [vmem:[#allocation3 + $0x288] ss:$16 sps:$4 sm:$0xff]  }
  0x80   :  { %1502 = vmatpush1.bf16.msra.mxu0 %v4376_v36  ;;  %1580 = vmatpush1.bf16.msra.mxu1 %v4373_v38  ;;  %v4459_v36 = vld [vmem:[#allocation3 + $0x4c8] ss:$16 sps:$4 sm:$0xff]   ;;  %v4467_v38 = vld [vmem:[#allocation3 + $0x4ac] ss:$16 sps:$4 sm:$0xff]  }
  0x81   :  { %1503 = vmatprep.subr.bf16.mxu0 %v4384_v39  ;;  %1581 = vmatprep.subr.bf16.mxu1 %v4381_v41  ;;  %v4465_v39 = vld [vmem:[#allocation3 + $0x4a8] ss:$16 sps:$4 sm:$0xff]   ;;  %v4476_v41 = vld [vmem:[#allocation3 + $0x24c] ss:$16 sps:$4 sm:$0xff]  }
  0x84   :  { %1504 = vmatpush1.bf16.msra.mxu0 %v4382_v42  ;;  %1582 = vmatpush1.bf16.msra.mxu1 %v4379_v43  ;;  %v4473_v42 = vld [vmem:[#allocation3 + $0x48c] ss:$16 sps:$4 sm:$0xff]   ;;  %v4474_v43 = vld [vmem:[#allocation3 + $0x248] ss:$16 sps:$4 sm:$0xff]  }
  0x85   :  { %1505 = vmatprep.subr.bf16.mxu0 %v4390_v44  ;;  %1583 = vmatprep.subr.bf16.mxu1 %v4387_v45  ;;  %v4471_v44 = vld [vmem:[#allocation3 + $0x488] ss:$16 sps:$4 sm:$0xff]   ;;  %v4479_v45 = vld [vmem:[#allocation3 + $0x46c] ss:$16 sps:$4 sm:$0xff]  }
  0x88   :  { %1506 = vmatpush1.bf16.msra.mxu0 %v4388_v46  ;;  %1584 = vmatpush1.bf16.msra.mxu1 %v4385_v47  ;;  %v4480_v46 = vld [vmem:[#allocation3 + $0x228] ss:$16 sps:$4 sm:$0xff]  }
  0x89   :  { %1507 = vmatprep.subr.bf16.mxu0 %v4396_v48  ;;  %1585 = vmatprep.subr.bf16.mxu1 %v4393_v49  ;;  %v4477_v47 = vld [vmem:[#allocation3 + $0x468] ss:$16 sps:$4 sm:$0xff]   ;;  %v4488_v48 = vld [vmem:[#allocation3 + $0x20c] ss:$16 sps:$4 sm:$0xff]  }
  0x8a   :  { %v4486_v49 = vld [vmem:[#allocation3 + $0x208] ss:$16 sps:$4 sm:$0xff]  }
  0x8c   :  { %1508 = vmatpush2.bf16.msra.mxu0 %v4394_v50  ;;  %1586 = vmatpush1.bf16.msra.mxu1 %v4391_v51  ;;  %v4483_v50 = vld [vmem:[#allocation3 + $0x448] ss:$16 sps:$4 sm:$0xff]   ;;  %v4494_v51 = vld [vmem:[#allocation3 + $0x3ec] ss:$16 sps:$4 sm:$0xff]  }
  0x8d   :  { %1509 = vmatprep.subr.bf16.mxu0 %v4402_v52  ;;  %1587 = vmatprep.subr.bf16.mxu1 %v4399_v53  ;;  %v4491_v52 = vld [vmem:[#allocation3 + $0x42c] ss:$16 sps:$4 sm:$0xff]   ;;  %v4492_v53 = vld [vmem:[#allocation3 + $0x3e8] ss:$16 sps:$4 sm:$0xff]  }
  0x90   :  { %1510 = vmatpush2.bf16.msra.mxu0 %v4400_v54  ;;  %1588 = vmatpush1.bf16.msra.mxu1 %v4397_v55  ;;  %v4489_v54 = vld [vmem:[#allocation3 + $0x428] ss:$16 sps:$4 sm:$0xff]   ;;  %v4500_v55 = vld [vmem:[#allocation3 + $0x3cc] ss:$16 sps:$4 sm:$0xff]  }
  0x91   :  { %1511 = vmatprep.subr.bf16.mxu0 %v4408_v56  ;;  %1589 = vmatprep.subr.bf16.mxu1 %v4405_v58  ;;  %v4497_v56 = vld [vmem:[#allocation3 + $0x40c] ss:$16 sps:$4 sm:$0xff]   ;;  %v4498_v58 = vld [vmem:[#allocation3 + $0x3c8] ss:$16 sps:$4 sm:$0xff]  }
  0x94   :  { %1512 = vmatpush2.bf16.msra.mxu0 %v4406_v59  ;;  %1590 = vmatpush2.bf16.msra.mxu1 %v4403_v60  ;;  %v4495_v59 = vld [vmem:[#allocation3 + $0x408] ss:$16 sps:$4 sm:$0xff]   ;;  %v4506_v60 = vld [vmem:[#allocation3 + $0x3ac] ss:$16 sps:$4 sm:$0xff]  }
  0x95   :  { %1513 = vmatprep.subr.bf16.mxu0 %v4414_v61  ;;  %1591 = vmatprep.subr.bf16.mxu1 %v4411_v62  ;;  %v4503_v61 = vld [vmem:[#allocation3 + $0x5ec] ss:$16 sps:$4 sm:$0xff]   ;;  %v4504_v62 = vld [vmem:[#allocation3 + $0x3a8] ss:$16 sps:$4 sm:$0xff]  }
  0x98   :  { %1514 = vmatpush2.bf16.msra.mxu0 %v4412_v63  ;;  %1592 = vmatpush2.bf16.msra.mxu1 %v4409_v1  ;;  %v4501_v63 = vld [vmem:[#allocation3 + $0x5e8] ss:$16 sps:$4 sm:$0xff]   ;;  %v4512_v1 = vld [vmem:[#allocation3 + $0x38c] ss:$16 sps:$4 sm:$0xff]  }
  0x99   :  { %1515 = vmatprep.subr.bf16.mxu0 %v4420_v2  ;;  %1593 = vmatprep.subr.bf16.mxu1 %v4417_v3  ;;  %v4509_v2 = vld [vmem:[#allocation3 + $0x5cc] ss:$16 sps:$4 sm:$0xff]   ;;  %v4510_v3 = vld [vmem:[#allocation3 + $0x388] ss:$16 sps:$4 sm:$0xff]  }
  0x9c   :  { %1516 = vmatpush2.bf16.msra.mxu0 %v4418_v4  ;;  %1594 = vmatpush2.bf16.msra.mxu1 %v4415_v5  ;;  %v4507_v4 = vld [vmem:[#allocation3 + $0x5c8] ss:$16 sps:$4 sm:$0xff]   ;;  %v4518_v5 = vld [vmem:[#allocation3 + $0x36c] ss:$16 sps:$4 sm:$0xff]  }
  0x9d   :  { %1517 = vmatprep.subr.bf16.mxu0 %v4426_v6  ;;  %1595 = vmatprep.subr.bf16.mxu1 %v4423_v7  ;;  %v4515_v6 = vld [vmem:[#allocation3 + $0x5ac] ss:$16 sps:$4 sm:$0xff]   ;;  %v4516_v7 = vld [vmem:[#allocation3 + $0x368] ss:$16 sps:$4 sm:$0xff]  }
  0xa0   :  { %1518 = vmatpush2.bf16.msra.mxu0 %v4424_v8  ;;  %1596 = vmatpush2.bf16.msra.mxu1 %v4421_v9  ;;  %v4513_v8 = vld [vmem:[#allocation3 + $0x5a8] ss:$16 sps:$4 sm:$0xff]   ;;  %v4524_v9 = vld [vmem:[#allocation3 + $0x34c] ss:$16 sps:$4 sm:$0xff]  }
  0xa1   :  { %1519 = vmatprep.subr.bf16.mxu0 %v4432_v10  ;;  %1597 = vmatprep.subr.bf16.mxu1 %v4429_v11  ;;  %v4521_v10 = vld [vmem:[#allocation3 + $0x58c] ss:$16 sps:$4 sm:$0xff]   ;;  %v4522_v11 = vld [vmem:[#allocation3 + $0x348] ss:$16 sps:$4 sm:$0xff]  }
  0xa4   :  { %1520 = vmatpush2.bf16.msra.mxu0 %v4430_v12  ;;  %1598 = vmatpush2.bf16.msra.mxu1 %v4427_v13  ;;  %v4519_v12 = vld [vmem:[#allocation3 + $0x588] ss:$16 sps:$4 sm:$0xff]   ;;  %v4530_v13 = vld [vmem:[#allocation3 + $0x32c] ss:$16 sps:$4 sm:$0xff]  }
  0xa5   :  { %1521 = vmatprep.subr.bf16.mxu0 %v4438_v14  ;;  %1599 = vmatprep.subr.bf16.mxu1 %v4435_v16  ;;  %v4527_v14 = vld [vmem:[#allocation3 + $0x56c] ss:$16 sps:$4 sm:$0xff]   ;;  %v4528_v16 = vld [vmem:[#allocation3 + $0x328] ss:$16 sps:$4 sm:$0xff]  }
  0xa8   :  { %1522 = vmatpush2.bf16.msra.mxu0 %v4436_v18  ;;  %1600 = vmatpush2.bf16.msra.mxu1 %v4433_v19  ;;  %v4525_v18 = vld [vmem:[#allocation3 + $0x568] ss:$16 sps:$4 sm:$0xff]   ;;  %v4536_v19 = vld [vmem:[#allocation3 + $0x30c] ss:$16 sps:$4 sm:$0xff]  }
  0xa9   :  { %1614 = vmatprep.subr.bf16.mxu0 %v4446_v20  ;;  %1601 = vmatprep.subr.bf16.mxu1 %v4443_v21  ;;  %v4533_v20 = vld [vmem:[#allocation3 + $0x54c] ss:$16 sps:$4 sm:$0xff]   ;;  %v4534_v21 = vld [vmem:[#allocation3 + $0x308] ss:$16 sps:$4 sm:$0xff]  }
  0xab   :  { %1524 = vmatmul.mubr.bf16.vlgmr.msra.gmra.mxu0 %v5127_v22 }
  0xac   :  { %1615 = vmatpush1.bf16.msra.mxu0 %v4444_v23  ;;  %1646 = vmatprep.mubr.bf16.mxu0 %v5099_v57  ;;  %v4468_v57 = vld [vmem:[#allocation3 + $0x268] ss:$16 sps:$4 sm:$0xff]  }
  0xad   :  { %1602 = vmatpush2.bf16.msra.mxu1 %v4441_v24  ;;  %1616 = vmatprep.subr.bf16.mxu0 %v4452_v25  ;;  %v4531_v23 = vld [vmem:[#allocation3 + $0x548] ss:$16 sps:$4 sm:$0xff]   ;;  %v4542_v24 = vld [vmem:[#allocation3 + $0x60c] ss:$16 sps:$4 sm:$0xff]  }
  0xae   :  { %1603 = vmatprep.subr.bf16.mxu1 %v4449_v26  ;;  %v4539_v25 = vld [vmem:[#allocation3 + $0x52c] ss:$16 sps:$4 sm:$0xff]   ;;  %v4540_v26 = vld [vmem:[#allocation3 + $0x608] ss:$16 sps:$4 sm:$0xff]  }
  0xb0   :  { %1617 = vmatpush1.bf16.msra.mxu0 %v4450_v27  ;;  %v4537_v27 = vld [vmem:[#allocation3 + $0x528] ss:$16 sps:$4 sm:$0xff]  }
  0xb1   :  { %1604 = vmatpush2.bf16.msra.mxu1 %v4447_v28  ;;  %1618 = vmatprep.subr.bf16.mxu0 %v4458_v29  ;;  %v4548_v28 = vld [vmem:[#allocation5 + $0xe4] ss:$16 sps:$4 sm:$0xff]   ;;  %v4545_v29 = vld [vmem:[#allocation3 + $0x50c] ss:$16 sps:$4 sm:$0xff]  }
  0xb2   :  { %1655 = vmatprep.subr.bf16.mxu1 %v4455_v30 }
  0xb4   :  { %1606 = vmatmul.mubr.bf16.vlgmr.msra.gmra.mxu1 %v5103_v15  ;;  %1619 = vmatpush1.bf16.msra.mxu0 %v4456_v31  ;;  %v4482_v15 = vld [vmem:[#allocation3 + $0x22c] ss:$16 sps:$4 sm:$0xff]  }
  0xb5   :  { %1656 = vmatpush1.bf16.msra.mxu1 %v4453_v32  ;;  %1620 = vmatprep.subr.bf16.mxu0 %v4464_v33 }
  0xb6   :  { %1657 = vmatprep.subr.bf16.mxu1 %v4461_v34  ;;  %1687 = vmatprep.mubr.bf16.mxu1 %v5122_v40  ;;  %v4485_v40 = vld [vmem:[#allocation3 + $0x44c] ss:$16 sps:$4 sm:$0xff]   ;;  %v4543_v34 = vld [vmem:[#allocation3 + $0x508] ss:$16 sps:$4 sm:$0xff]  }
  0xb8   :  { %1621 = vmatpush1.bf16.msra.mxu0 %v4462_v35  ;;  %v4546_v35 = vld [vmem:[#allocation5 + $0xe0] ss:$16 sps:$4 sm:$0xff]  }
  0xb9   :  { %1658 = vmatpush1.bf16.msra.mxu1 %v4459_v36  ;;  %1622 = vmatprep.subr.bf16.mxu0 %v4470_v37 }
  0xba   :  { %1659 = vmatprep.subr.bf16.mxu1 %v4467_v38 }
  0xbc   :  { %1623 = vmatpush1.bf16.msra.mxu0 %v4468_v57 }
  0xbd   :  { %1660 = vmatpush1.bf16.msra.mxu1 %v4465_v39  ;;  %1624 = vmatprep.subr.bf16.mxu0 %v4476_v41  ;;  %v4551_v39 = vld [vmem:[#allocation5 + $0xc4] ss:$16 sps:$4 sm:$0xff]   ;;  %v4549_v41 = vld [vmem:[#allocation5 + $0xc0] ss:$16 sps:$4 sm:$0xff]  }
  0xbe   :  { %1661 = vmatprep.subr.bf16.mxu1 %v4473_v42  ;;  %v4552_v42 = vld [vmem:[#allocation5 + $0xa0] ss:$16 sps:$4 sm:$0xff]  }
  0xc0   :  { %1625 = vmatpush1.bf16.msra.mxu0 %v4474_v43  ;;  %v4557_v43 = vld [vmem:[#allocation5 + $0x84] ss:$16 sps:$4 sm:$0xff]  }
  0xc1   :  { %1662 = vmatpush1.bf16.msra.mxu1 %v4471_v44  ;;  %1626 = vmatprep.subr.bf16.mxu0 %v4482_v15  ;;  %v4555_v44 = vld [vmem:[#allocation5 + $0x80] ss:$16 sps:$4 sm:$0xff]   ;;  %v4560_v15 = vld [vmem:[#allocation5 + $0x64] ss:$16 sps:$4 sm:$0xff]  }
  0xc2   :  { %1663 = vmatprep.subr.bf16.mxu1 %v4479_v45  ;;  %v4558_v45 = vld [vmem:[#allocation5 + $0x60] ss:$16 sps:$4 sm:$0xff]  }
  0xc4   :  { %1627 = vmatpush1.bf16.msra.mxu0 %v4480_v46  ;;  %v4600_v46 = vld [vmem:[#allocation5 + $0x2e0] ss:$16 sps:$4 sm:$0xff]  }
  0xc5   :  { %1664 = vmatpush1.bf16.msra.mxu1 %v4477_v47  ;;  %1628 = vmatprep.subr.bf16.mxu0 %v4488_v48  ;;  %v4602_v47 = vld [vmem:[#allocation5 + $0x2e4] ss:$16 sps:$4 sm:$0xff]   ;;  %v4606_v48 = vld [vmem:[#allocation5 + $0x2c0] ss:$16 sps:$4 sm:$0xff]  }
  0xc6   :  { %1665 = vmatprep.subr.bf16.mxu1 %v4485_v40  ;;  %v4563_v40 = vld [vmem:[#allocation5 + $0x44] ss:$16 sps:$4 sm:$0xff]  }
  0xc8   :  { %1629 = vmatpush1.bf16.msra.mxu0 %v4486_v49  ;;  %v4608_v49 = vld [vmem:[#allocation5 + $0x2c4] ss:$16 sps:$4 sm:$0xff]  }
  0xc9   :  { %1666 = vmatpush1.bf16.msra.mxu1 %v4483_v50  ;;  %1630 = vmatprep.subr.bf16.mxu0 %v4494_v51  ;;  %v4566_v50 = vld [vmem:[#allocation5 + $0x24] ss:$16 sps:$4 sm:$0xff]   ;;  %v4564_v51 = vld [vmem:[#allocation5 + $0x20] ss:$16 sps:$4 sm:$0xff]  }
  0xca   :  { %1667 = vmatprep.subr.bf16.mxu1 %v4491_v52  ;;  %v4612_v52 = vld [vmem:[#allocation5 + $0x2a0] ss:$16 sps:$4 sm:$0xff]  }
  0xcc   :  { %1631 = vmatpush2.bf16.msra.mxu0 %v4492_v53  ;;  %v4614_v53 = vld [vmem:[#allocation5 + $0x2a4] ss:$16 sps:$4 sm:$0xff]  }
  0xcd   :  { %1668 = vmatpush1.bf16.msra.mxu1 %v4489_v54  ;;  %1632 = vmatprep.subr.bf16.mxu0 %v4500_v55  ;;  %v4569_v54 = vld [vmem:[#allocation5 + $0x4] ss:$16 sps:$4 sm:$0xff]   ;;  %v4567_v55 = vld [vmem:[#allocation5] ss:$16 sps:$4 sm:$0xff]  }
  0xce   :  { %1669 = vmatprep.subr.bf16.mxu1 %v4497_v56  ;;  %v4618_v56 = vld [vmem:[#allocation5 + $0x280] ss:$16 sps:$4 sm:$0xff]  }
  0xd0   :  { %1633 = vmatpush2.bf16.msra.mxu0 %v4498_v58  ;;  %v4620_v58 = vld [vmem:[#allocation5 + $0x284] ss:$16 sps:$4 sm:$0xff]  }
  0xd1   :  { %1670 = vmatpush1.bf16.msra.mxu1 %v4495_v59  ;;  %1634 = vmatprep.subr.bf16.mxu0 %v4506_v60  ;;  %v4572_v59 = vld [vmem:[#allocation5 + $0x1e4] ss:$16 sps:$4 sm:$0xff]   ;;  %v4570_v60 = vld [vmem:[#allocation5 + $0x1e0] ss:$16 sps:$4 sm:$0xff]  }
  0xd2   :  { %1671 = vmatprep.subr.bf16.mxu1 %v4503_v61  ;;  %v4624_v61 = vld [vmem:[#allocation5 + $0x260] ss:$16 sps:$4 sm:$0xff]  }
  0xd4   :  { %1635 = vmatpush2.bf16.msra.mxu0 %v4504_v62  ;;  %v4626_v62 = vld [vmem:[#allocation5 + $0x264] ss:$16 sps:$4 sm:$0xff]  }
  0xd5   :  { %1672 = vmatpush2.bf16.msra.mxu1 %v4501_v63  ;;  %1636 = vmatprep.subr.bf16.mxu0 %v4512_v1  ;;  %v4575_v63 = vld [vmem:[#allocation5 + $0x1c4] ss:$16 sps:$4 sm:$0xff]   ;;  %v4630_v1 = vld [vmem:[#allocation5 + $0x240] ss:$16 sps:$4 sm:$0xff]  }
  0xd6   :  { %1673 = vmatprep.subr.bf16.mxu1 %v4509_v2  ;;  %v4632_v2 = vld [vmem:[#allocation5 + $0x244] ss:$16 sps:$4 sm:$0xff]  }
  0xd8   :  { %1637 = vmatpush2.bf16.msra.mxu0 %v4510_v3  ;;  %v4573_v3 = vld [vmem:[#allocation5 + $0x1c0] ss:$16 sps:$4 sm:$0xff]  }
  0xd9   :  { %1674 = vmatpush2.bf16.msra.mxu1 %v4507_v4  ;;  %1638 = vmatprep.subr.bf16.mxu0 %v4518_v5  ;;  %v4578_v4 = vld [vmem:[#allocation5 + $0x1a4] ss:$16 sps:$4 sm:$0xff]   ;;  %v4636_v5 = vld [vmem:[#allocation5 + $0x220] ss:$16 sps:$4 sm:$0xff]  }
  0xda   :  { %1675 = vmatprep.subr.bf16.mxu1 %v4515_v6  ;;  %v4638_v6 = vld [vmem:[#allocation5 + $0x224] ss:$16 sps:$4 sm:$0xff]  }
  0xdc   :  { %1639 = vmatpush2.bf16.msra.mxu0 %v4516_v7  ;;  %v4576_v7 = vld [vmem:[#allocation5 + $0x1a0] ss:$16 sps:$4 sm:$0xff]  }
  0xdd   :  { %1676 = vmatpush2.bf16.msra.mxu1 %v4513_v8  ;;  %1640 = vmatprep.subr.bf16.mxu0 %v4524_v9  ;;  %v4581_v8 = vld [vmem:[#allocation5 + $0x184] ss:$16 sps:$4 sm:$0xff]   ;;  %v4642_v9 = vld [vmem:[#allocation5 + $0x200] ss:$16 sps:$4 sm:$0xff]  }
  0xde   :  { %1677 = vmatprep.subr.bf16.mxu1 %v4521_v10  ;;  %v4644_v10 = vld [vmem:[#allocation5 + $0x204] ss:$16 sps:$4 sm:$0xff]  }
  0xe0   :  { %1641 = vmatpush2.bf16.msra.mxu0 %v4522_v11  ;;  %v4579_v11 = vld [vmem:[#allocation5 + $0x180] ss:$16 sps:$4 sm:$0xff]  }
  0xe1   :  { %1678 = vmatpush2.bf16.msra.mxu1 %v4519_v12  ;;  %1642 = vmatprep.subr.bf16.mxu0 %v4530_v13  ;;  %v4584_v12 = vld [vmem:[#allocation5 + $0x164] ss:$16 sps:$4 sm:$0xff]   ;;  %v4648_v13 = vld [vmem:[#allocation5 + $0x3e0] ss:$16 sps:$4 sm:$0xff]  }
  0xe2   :  { %1679 = vmatprep.subr.bf16.mxu1 %v4527_v14  ;;  %v4650_v14 = vld [vmem:[#allocation5 + $0x3e4] ss:$16 sps:$4 sm:$0xff]  }
  0xe4   :  { %1643 = vmatpush2.bf16.msra.mxu0 %v4528_v16  ;;  %v4582_v16 = vld [vmem:[#allocation5 + $0x160] ss:$16 sps:$4 sm:$0xff]  }
  0xe5   :  { %1680 = vmatpush2.bf16.msra.mxu1 %v4525_v18  ;;  %1644 = vmatprep.subr.bf16.mxu0 %v4536_v19  ;;  %v4587_v18 = vld [vmem:[#allocation5 + $0x144] ss:$16 sps:$4 sm:$0xff]   ;;  %v4654_v19 = vld [vmem:[#allocation5 + $0x3c0] ss:$16 sps:$4 sm:$0xff]  }
  0xe6   :  { %1681 = vmatprep.subr.bf16.mxu1 %v4533_v20  ;;  %v4656_v20 = vld [vmem:[#allocation5 + $0x3c4] ss:$16 sps:$4 sm:$0xff]  }
  0xe8   :  { %1645 = vmatpush2.bf16.msra.mxu0 %v4534_v21  ;;  %v4585_v21 = vld [vmem:[#allocation5 + $0x140] ss:$16 sps:$4 sm:$0xff]  }
  0xe9   :  { %1682 = vmatpush2.bf16.msra.mxu1 %v4531_v23  ;;  %1710 = vmatprep.subr.bf16.mxu0 %v4542_v24  ;;  %v4590_v23 = vld [vmem:[#allocation5 + $0x124] ss:$16 sps:$4 sm:$0xff]   ;;  %v4660_v24 = vld [vmem:[#allocation5 + $0x3a0] ss:$16 sps:$4 sm:$0xff]  }
  0xea   :  { %1683 = vmatprep.subr.bf16.mxu1 %v4539_v25  ;;  %v4662_v25 = vld [vmem:[#allocation5 + $0x3a4] ss:$16 sps:$4 sm:$0xff]  }
  0xeb   :  { %v5133_v30 = vpop.f32.mrf.mxu0  ;;  %v5135_v31 = vpop.f32.mrf.mxu1  ;;  %1647 = vmatmul.mubr.bf16.vlgmr.msra.gmra.mxu0 %v5105_v17  ;;  %v4554_v17 = vld [vmem:[#allocation5 + $0xa4] ss:$16 sps:$4 sm:$0xff]  }
  0xec   :  { %1711 = vmatpush1.bf16.msra.mxu0 %v4540_v26  ;;  %1728 = vmatprep.mubr.bf16.mxu0 %v5004_v0  ;;  %v4934_v0 = vld [vmem:[%s5240_s0 + $0x18] ss:$0 sps:$4 sm:$0xff]   ;;  %v4588_v26 = vld [vmem:[#allocation5 + $0x120] ss:$16 sps:$4 sm:$0xff]  }
  0xed   :  { %1684 = vmatpush2.bf16.msra.mxu1 %v4537_v27  ;;  %v5139_v32 = vpop.f32.mrf.mxu0  ;;  %v5141_v33 = vpop.f32.mrf.mxu1  ;;  %2569 = vmatprep.subr.bf16.mxu0 %v4548_v28  ;;  %v4593_v27 = vld [vmem:[#allocation5 + $0x104] ss:$16 sps:$4 sm:$0xff]  }
  0xee   :  { %1685 = vmatprep.subr.bf16.mxu1 %v4545_v29 }
  0xef   :  { %v357_v36 = vpop.f32.mrf.mxu0  ;;  %v398_v37 = vpop.f32.mrf.mxu1 }
  0xf0   :  { %v4666_v36 = vld [vmem:[#allocation5 + $0x380] ss:$16 sps:$4 sm:$0xff]   ;;  %v4668_v37 = vld [vmem:[#allocation5 + $0x384] ss:$16 sps:$4 sm:$0xff]  }
  0xf1   :  { %1686 = vmatpush2.bf16.msra.mxu1 %v4543_v34  ;;  %v358_v38 = vpop.f32.mrf.mxu0  ;;  %v399_v57 = vpop.f32.mrf.mxu1 }
  0xf2   :  { %2610 = vmatprep.subr.bf16.mxu1 %v4602_v47  ;;  %v4596_v57 = vld [vmem:[#allocation5 + $0xec] ss:$16 sps:$4 sm:$0xff]  }
  0xf3   :  { %3975 = vmatmul.mubr.msk.bf16.vlgmr.msra.gmra.mxu0 %vm1405_vm2, %v4934_v0 }
  0xf4   :  { %1688 = vmatmul.mubr.bf16.vlgmr.msra.gmra.mxu1 %v5127_v22  ;;  %2570 = vmatpush1.bf16.msra.mxu0 %v4546_v35  ;;  %v4561_v22 = vld [vmem:[#allocation5 + $0x40] ss:$16 sps:$4 sm:$0xff]  }
  0xf5   :  { %2571 = vmatprep.subr.bf16.mxu0 %v4551_v39  ;;  %2611 = vmatpush1.bf16.msra.mxu1 %v4600_v46  ;;  %v4591_v35 = vld [vmem:[#allocation5 + $0x100] ss:$16 sps:$4 sm:$0xff]  }
  0xf6   :  { %2612 = vmatprep.subr.bf16.mxu1 %v4608_v49  ;;  %v4678_v46 = vld [vmem:[#allocation5 + $0x340] ss:$16 sps:$4 sm:$0xff]  }
  0xf8   :  { %2572 = vmatpush1.bf16.msra.mxu0 %v4549_v41 }
  0xf9   :  { %2573 = vmatprep.subr.bf16.mxu0 %v4554_v17  ;;  %2613 = vmatpush1.bf16.msra.mxu1 %v4606_v48  ;;  %v4672_v17 = vld [vmem:[#allocation5 + $0x360] ss:$16 sps:$4 sm:$0xff]  }
  0xfa   :  { %2614 = vmatprep.subr.bf16.mxu1 %v4614_v53  ;;  %v4684_v48 = vld [vmem:[#allocation5 + $0x320] ss:$16 sps:$4 sm:$0xff]   ;;  %v1739_v53 = vlaneseq }
  0xfc   :  { %2574 = vmatpush1.bf16.msra.mxu0 %v4552_v42  ;;  %v4674_v42 = vld [vmem:[#allocation5 + $0x364] ss:$16 sps:$4 sm:$0xff]  }
  0xfd   :  { %2575 = vmatprep.subr.bf16.mxu0 %v4557_v43  ;;  %2615 = vmatpush1.bf16.msra.mxu1 %v4612_v52  ;;  %v4692_v52 = vld [vmem:[#allocation5 + $0x2ec] ss:$16 sps:$4 sm:$0xff]  }
  0xfe   :  { %2616 = vmatprep.subr.bf16.mxu1 %v4620_v58  ;;  %v5158_v58 = vld [vmem:[%s5244_s4] sm:$0xf] }
 0x100   :  { %2576 = vmatpush1.bf16.msra.mxu0 %v4555_v44 }
 0x101   :  { %2577 = vmatprep.subr.bf16.mxu0 %v4560_v15  ;;  %2617 = vmatpush1.bf16.msra.mxu1 %v4618_v56 }
 0x102   :  { %2618 = vmatprep.subr.bf16.mxu1 %v4626_v62 }
 0x104   :  { %2578 = vmatpush1.bf16.msra.mxu0 %v4558_v45  ;;  %v4680_v45 = vld [vmem:[#allocation5 + $0x344] ss:$16 sps:$4 sm:$0xff]  }
 0x105   :  { %2579 = vmatprep.subr.bf16.mxu0 %v4563_v40  ;;  %2619 = vmatpush1.bf16.msra.mxu1 %v4624_v61 }
 0x106   :  { %2620 = vmatprep.subr.bf16.mxu1 %v4632_v2 }
 0x108   :  { %2580 = vmatpush1.bf16.msra.mxu0 %v4561_v22  ;;  %v4686_v22 = vld [vmem:[#allocation5 + $0x324] ss:$16 sps:$4 sm:$0xff]  }
 0x109   :  { %2581 = vmatprep.subr.bf16.mxu0 %v4566_v50  ;;  %2621 = vmatpush1.bf16.msra.mxu1 %v4630_v1  ;;  %v4689_v50 = vld [vmem:[#allocation5 + $0x304] ss:$16 sps:$4 sm:$0xff]  }
 0x10a   :  { %2622 = vmatprep.subr.bf16.mxu1 %v4638_v6 }
 0x10c   :  { %2582 = vmatpush1.bf16.msra.mxu0 %v4564_v51  ;;  %v4687_v51 = vld [vmem:[#allocation5 + $0x300] ss:$16 sps:$4 sm:$0xff]  }
 0x10d   :  { %2583 = vmatprep.subr.bf16.mxu0 %v4569_v54  ;;  %2623 = vmatpush1.bf16.msra.mxu1 %v4636_v5  ;;  %v5149_v54 = vshrl.u32 %v1739_v53, 7 }
 0x10e   :  { %2624 = vmatprep.subr.bf16.mxu1 %v4644_v10 }
 0x10f   :  { %v5153_v56 = vsub.s32 0, %v5149_v54 }
 0x110   :  { %2584 = vmatpush1.bf16.msra.mxu0 %v4567_v55 }
 0x111   :  { %2585 = vmatprep.subr.bf16.mxu0 %v4572_v59  ;;  %2625 = vmatpush1.bf16.msra.mxu1 %v4642_v9  ;;  %v5161_v59 = vsub.s32 1, %v5149_v54 }
 0x112   :  { %2626 = vmatprep.subr.bf16.mxu1 %v4650_v14 }
 0x114   :  { %2586 = vmatpush2.bf16.msra.mxu0 %v4570_v60 }
 0x115   :  { %2587 = vmatprep.subr.bf16.mxu0 %v4575_v63  ;;  %2627 = vmatpush2.bf16.msra.mxu1 %v4648_v13  ;;  %v1742_v63 = vrot.slane %v5158_v58, %v5153_v56 }
 0x116   :  { %2628 = vmatprep.subr.bf16.mxu1 %v4656_v20 }
 0x118   :  { %2588 = vmatpush2.bf16.msra.mxu0 %v4573_v3  ;;  %v1746_v3 = vrot.slane %v5158_v58, %v5161_v59 }
 0x119   :  { %2589 = vmatprep.subr.bf16.mxu0 %v4578_v4  ;;  %2629 = vmatpush2.bf16.msra.mxu1 %v4654_v19 }
 0x11a   :  { %2630 = vmatprep.subr.bf16.mxu1 %v4662_v25  ;;  %v4605_v25 = vld [vmem:[#allocation5 + $0xac] ss:$16 sps:$4 sm:$0xff]  }
 0x11c   :  { %2590 = vmatpush2.bf16.msra.mxu0 %v4576_v7 }
 0x11d   :  { %2591 = vmatprep.subr.bf16.mxu0 %v4581_v8  ;;  %2631 = vmatpush2.bf16.msra.mxu1 %v4660_v24  ;;  %v4597_v24 = vld [vmem:[#allocation5 + $0xc8] ss:$16 sps:$4 sm:$0xff]  }
 0x11e   :  { %2632 = vmatprep.subr.bf16.mxu1 %v4668_v37  ;;  %v4629_v37 = vld [vmem:[#allocation5 + $0x2c] ss:$16 sps:$4 sm:$0xff]  }
 0x120   :  { %2592 = vmatpush2.bf16.msra.mxu0 %v4579_v11 }
 0x121   :  { %2593 = vmatprep.subr.bf16.mxu0 %v4584_v12  ;;  %2633 = vmatpush2.bf16.msra.mxu1 %v4666_v36  ;;  %v4621_v36 = vld [vmem:[#allocation5 + $0x48] ss:$16 sps:$4 sm:$0xff]  }
 0x122   :  { %2634 = vmatprep.subr.bf16.mxu1 %v4674_v42  ;;  %v4645_v42 = vld [vmem:[#allocation5 + $0x1c8] ss:$16 sps:$4 sm:$0xff]  }
 0x124   :  { %2594 = vmatpush2.bf16.msra.mxu0 %v4582_v16 }
 0x125   :  { %2595 = vmatprep.subr.bf16.mxu0 %v4587_v18  ;;  %2635 = vmatpush2.bf16.msra.mxu1 %v4672_v17  ;;  %v4594_v18 = vld [vmem:[#allocation5 + $0xe8] ss:$16 sps:$4 sm:$0xff]   ;;  %v4647_v17 = vld [vmem:[#allocation5 + $0x1cc] ss:$16 sps:$4 sm:$0xff]  }
 0x126   :  { %2636 = vmatprep.subr.bf16.mxu1 %v4680_v45  ;;  %v4665_v45 = vld [vmem:[#allocation5 + $0x16c] ss:$16 sps:$4 sm:$0xff]  }
 0x128   :  { %2596 = vmatpush2.bf16.msra.mxu0 %v4585_v21  ;;  %v4599_v21 = vld [vmem:[#allocation5 + $0xcc] ss:$16 sps:$4 sm:$0xff]  }
 0x129   :  { %2597 = vmatprep.subr.bf16.mxu0 %v4590_v23  ;;  %2637 = vmatpush2.bf16.msra.mxu1 %v4678_v46  ;;  %v4663_v46 = vld [vmem:[#allocation5 + $0x168] ss:$16 sps:$4 sm:$0xff]  }
 0x12a   :  { %2638 = vmatprep.subr.bf16.mxu1 %v4686_v22  ;;  %v4669_v22 = vld [vmem:[#allocation5 + $0x148] ss:$16 sps:$4 sm:$0xff]  }
 0x12b   :  { %v1443_v28 = vpop.f32.mrf.mxu0  ;;  %v1484_v34 = vpop.f32.mrf.mxu1 }
 0x12c   :  { %v1444_v29 = vadd.f32 %v1443_v28, %v5133_v30  ;;  %2598 = vmatpush2.bf16.msra.mxu0 %v4588_v26  ;;  %v4603_v26 = vld [vmem:[#allocation5 + $0xa8] ss:$16 sps:$4 sm:$0xff]  }
 0x12d   :  { %v1445_v38 = vpop.f32.mrf.mxu0  ;;  %2599 = vmatprep.subr.bf16.mxu0 %v4593_v27  ;;  %v1486_v41 = vpop.f32.mrf.mxu1  ;;  %2639 = vmatpush2.bf16.msra.mxu1 %v4684_v48  ;;  %v4611_v27 = vld [vmem:[#allocation5 + $0x8c] ss:$16 sps:$4 sm:$0xff]   ;;  %v4609_v28 = vld [vmem:[#allocation5 + $0x88] ss:$16 sps:$4 sm:$0xff]  }
 0x12e   :  { %v1485_v39 = vadd.f32 %v1484_v34, %v1444_v29  ;;  %2640 = vmatprep.subr.bf16.mxu1 %v4689_v50  ;;  %v1446_v55 = vadd.f32 %v1445_v38, %v5139_v32  ;;  %v4617_v29 = vld [vmem:[#allocation5 + $0x6c] ss:$16 sps:$4 sm:$0xff]   ;;  %v4615_v34 = vld [vmem:[#allocation5 + $0x68] ss:$16 sps:$4 sm:$0xff]  }
 0x12f   :  { %v1447_v0 = vpop.f32.mrf.mxu0  ;;  %v1488_v43 = vpop.f32.mrf.mxu1  ;;  %v4627_v38 = vld [vmem:[#allocation5 + $0x28] ss:$16 sps:$4 sm:$0xff]   ;;  %v4677_v48 = vld [vmem:[#allocation5 + $0x12c] ss:$16 sps:$4 sm:$0xff]  }
 0x130   :  { %2600 = vmatpush2.bf16.msra.mxu0 %v4591_v35  ;;  %v1487_v61 = vadd.f32 %v1486_v41, %v1446_v55  ;;  %v4623_v35 = vld [vmem:[#allocation5 + $0x4c] ss:$16 sps:$4 sm:$0xff]   ;;  %v4639_v0 = vld [vmem:[#allocation5 + $0x1e8] ss:$16 sps:$4 sm:$0xff]  }
 0x131   :  { %v1448_v44 = vpop.f32.mrf.mxu0  ;;  %2651 = vmatprep.subr.bf16.mxu0 %v4596_v57  ;;  %v1489_v30 = vpop.f32.mrf.mxu1  ;;  %2641 = vmatpush2.bf16.msra.mxu1 %v4687_v51  ;;  %v4635_v57 = vld [vmem:[#allocation5 + $0xc] ss:$16 sps:$4 sm:$0xff]   ;;  %v4675_v51 = vld [vmem:[#allocation5 + $0x128] ss:$16 sps:$4 sm:$0xff]  }
 0x132   :  { %2692 = vmatprep.subr.bf16.mxu1 %v4692_v52  ;;  %v4641_v41 = vld [vmem:[#allocation5 + $0x1ec] ss:$16 sps:$4 sm:$0xff]   ;;  %v4651_v44 = vld [vmem:[#allocation5 + $0x1a8] ss:$16 sps:$4 sm:$0xff]  }
 0x133   :  { %v1566_v15 = vpop.f32.mrf.mxu1  ;;  %v4653_v43 = vld [vmem:[#allocation5 + $0x1ac] ss:$16 sps:$4 sm:$0xff]  }
 0x134   :  { %v4659_v30 = vld [vmem:[#allocation5 + $0x18c] ss:$16 sps:$4 sm:$0xff]  }
 0x135   :  { %v1568_v47 = vpop.f32.mrf.mxu1  ;;  %v4683_v52 = vld [vmem:[#allocation5 + $0x10c] ss:$16 sps:$4 sm:$0xff]  }
 0x137   :  { %v1570_v40 = vpop.f32.mrf.mxu1 }
 0x139   :  { %v1571_v49 = vpop.f32.mrf.mxu1 }
 0x16b   :  { %v1525_v60 = vpop.f32.mrf.mxu0 }
 0x16c   :  { %v1526_v62 = vadd.f32 %v1525_v60, %v1485_v39  ;;  %v4633_v39 = vld [vmem:[#allocation5 + $0x8] ss:$16 sps:$4 sm:$0xff]   ;;  %v5177_v60 = vsub.s32 2, %v5149_v54 }
 0x16d   :  { %v1527_v1 = vpop.f32.mrf.mxu0 }
 0x16e   :  { %v1567_v2 = vadd.f32 %v1566_v15, %v1526_v62  ;;  %v1528_v32 = vadd.f32 %v1527_v1, %v1487_v61  ;;  %v4657_v15 = vld [vmem:[#allocation5 + $0x188] ss:$16 sps:$4 sm:$0xff]   ;;  %v5182_v1 = vsub.s32 3, %v5149_v54 }
 0x16f   :  { %v1529_v4 = vpop.f32.mrf.mxu0 }
 0x170   :  { %v1759_v5 = vadd.f32 %v1742_v63, %v1567_v2  ;;  %v1569_v6 = vadd.f32 %v1568_v47, %v1528_v32  ;;  %v4671_v47 = vld [vmem:[#allocation5 + $0x14c] ss:$16 sps:$4 sm:$0xff]   ;;  %v4681_v2 = vld [vmem:[#allocation5 + $0x108] ss:$16 sps:$4 sm:$0xff]  }
 0x171   :  { %v1530_v7 = vpop.f32.mrf.mxu0 }
 0x172   :  { %vm1763_vm3 = vcmp.gt.f32.partialorder %v1759_v5, 0.0  ;;  %v1767_v8 = vmul.f32 0.2, %v1759_v5  ;;  %v1760_v9 = vadd.f32 %v1746_v3, %v1569_v6 }
 0x174   :  { %v5167_v10 = vpop.f32.mrf.mxu1  ;;  %vm1764_vm4 = vcmp.gt.f32.partialorder %v1760_v9, 0.0  ;;  %v1768_v11 = vmul.f32 0.2, %v1760_v9  ;;  %v1771_v12 = vsel %vm1763_vm3, %v1759_v5, %v1767_v8 }
 0x175   :  { %v5171_v20 = vpack.c.bf16 %v1771_v12, %v1771_v12  ;;  %v1608_v53 = vadd.f32 %v5167_v10, %v5135_v31  ;;  %v1750_v31 = vrot.slane %v5158_v58, %v5177_v60 }
 0x176   :  { %v5169_v13 = vpop.f32.mrf.mxu1  ;;  %v1772_v14 = vsel %vm1764_vm4, %v1760_v9, %v1768_v11 }
 0x177   :  { %v1776_v16 = vpack.c.bf16 %v1772_v14, %v1772_v14  ;;  %v1610_v61 = vadd.f32 %v5169_v13, %v5141_v33  ;;  %v1754_v33 = vrot.slane %v5158_v58, %v5182_v1  ;;  %v4740_v58 = vld [vmem:[#allocation7 + $0xe4] ss:$16 sps:$4 sm:$0xff]  }
 0x178   :  { %v1611_v19 = vpop.f32.mrf.mxu1 }
 0x179   :  { %2601 = vmatprep.mubr.bf16.mxu0 %v1776_v16 }
 0x17a   :  { %v1612_v23 = vpop.f32.mrf.mxu1  ;;  %2602 = vmatmul.mubr.bf16.vlgmr.msra.gmra.mxu0 %v5171_v20 }
 0x17b   :  { %2652 = vmatpush1.bf16.msra.mxu0 %v4594_v18  ;;  %2683 = vmatprep.mubr.bf16.mxu0 %v1776_v16 }
 0x17c   :  { %2653 = vmatprep.subr.bf16.mxu0 %v4599_v21 }
 0x17f   :  { %2654 = vmatpush1.bf16.msra.mxu0 %v4597_v24  ;;  %v4690_v24 = vld [vmem:[#allocation5 + $0x2e8] ss:$16 sps:$4 sm:$0xff]  }
 0x180   :  { %2655 = vmatprep.subr.bf16.mxu0 %v4605_v25  ;;  %v4738_v25 = vld [vmem:[#allocation7 + $0xe0] ss:$16 sps:$4 sm:$0xff]  }
 0x183   :  { %2656 = vmatpush1.bf16.msra.mxu0 %v4603_v26 }
 0x184   :  { %2657 = vmatprep.subr.bf16.mxu0 %v4611_v27  ;;  %v4695_v27 = vld [vmem:[#allocation5 + $0x2cc] ss:$16 sps:$4 sm:$0xff]  }
 0x187   :  { %2658 = vmatpush1.bf16.msra.mxu0 %v4609_v28  ;;  %v4743_v28 = vld [vmem:[#allocation7 + $0xc4] ss:$16 sps:$4 sm:$0xff]  }
 0x188   :  { %2659 = vmatprep.subr.bf16.mxu0 %v4617_v29  ;;  %v4693_v29 = vld [vmem:[#allocation5 + $0x2c8] ss:$16 sps:$4 sm:$0xff]  }
 0x18b   :  { %2660 = vmatpush1.bf16.msra.mxu0 %v4615_v34  ;;  %v4746_v34 = vld [vmem:[#allocation7 + $0xa4] ss:$16 sps:$4 sm:$0xff]  }
 0x18c   :  { %2661 = vmatprep.subr.bf16.mxu0 %v4623_v35  ;;  %v4698_v35 = vld [vmem:[#allocation5 + $0x2ac] ss:$16 sps:$4 sm:$0xff]  }
 0x18f   :  { %2662 = vmatpush1.bf16.msra.mxu0 %v4621_v36  ;;  %v4744_v36 = vld [vmem:[#allocation7 + $0xa0] ss:$16 sps:$4 sm:$0xff]  }
 0x190   :  { %2663 = vmatprep.subr.bf16.mxu0 %v4629_v37  ;;  %v4696_v37 = vld [vmem:[#allocation5 + $0x2a8] ss:$16 sps:$4 sm:$0xff]  }
 0x193   :  { %2664 = vmatpush1.bf16.msra.mxu0 %v4627_v38  ;;  %v4749_v38 = vld [vmem:[#allocation7 + $0x84] ss:$16 sps:$4 sm:$0xff]  }
 0x194   :  { %2665 = vmatprep.subr.bf16.mxu0 %v4635_v57  ;;  %v4701_v57 = vld [vmem:[#allocation5 + $0x28c] ss:$16 sps:$4 sm:$0xff]  }
 0x197   :  { %2666 = vmatpush1.bf16.msra.mxu0 %v4633_v39  ;;  %v4747_v39 = vld [vmem:[#allocation7 + $0x80] ss:$16 sps:$4 sm:$0xff]  }
 0x198   :  { %2667 = vmatprep.subr.bf16.mxu0 %v4641_v41  ;;  %v4699_v41 = vld [vmem:[#allocation5 + $0x288] ss:$16 sps:$4 sm:$0xff]  }
 0x19b   :  { %2668 = vmatpush2.bf16.msra.mxu0 %v4639_v0  ;;  %v4752_v0 = vld [vmem:[#allocation7 + $0x64] ss:$16 sps:$4 sm:$0xff]  }
 0x19c   :  { %2669 = vmatprep.subr.bf16.mxu0 %v4647_v17  ;;  %v4704_v17 = vld [vmem:[#allocation5 + $0x26c] ss:$16 sps:$4 sm:$0xff]  }
 0x19f   :  { %2670 = vmatpush2.bf16.msra.mxu0 %v4645_v42  ;;  %v4750_v42 = vld [vmem:[#allocation7 + $0x60] ss:$16 sps:$4 sm:$0xff]  }
 0x1a0   :  { %2671 = vmatprep.subr.bf16.mxu0 %v4653_v43  ;;  %v4702_v43 = vld [vmem:[#allocation5 + $0x268] ss:$16 sps:$4 sm:$0xff]  }
 0x1a3   :  { %2672 = vmatpush2.bf16.msra.mxu0 %v4651_v44  ;;  %v4755_v44 = vld [vmem:[#allocation7 + $0x44] ss:$16 sps:$4 sm:$0xff]  }
 0x1a4   :  { %2673 = vmatprep.subr.bf16.mxu0 %v4659_v30  ;;  %v4707_v30 = vld [vmem:[#allocation5 + $0x24c] ss:$16 sps:$4 sm:$0xff]  }
 0x1a7   :  { %2674 = vmatpush2.bf16.msra.mxu0 %v4657_v15  ;;  %v4753_v15 = vld [vmem:[#allocation7 + $0x40] ss:$16 sps:$4 sm:$0xff]  }
 0x1a8   :  { %2675 = vmatprep.subr.bf16.mxu0 %v4665_v45  ;;  %v4705_v45 = vld [vmem:[#allocation5 + $0x248] ss:$16 sps:$4 sm:$0xff]  }
 0x1ab   :  { %2676 = vmatpush2.bf16.msra.mxu0 %v4663_v46  ;;  %v1648_v40 = vpop.f32.mrf.mxu0  ;;  %v4758_v46 = vld [vmem:[#allocation7 + $0x24] ss:$16 sps:$4 sm:$0xff]  }
 0x1ac   :  { %2677 = vmatprep.subr.bf16.mxu0 %v4671_v47  ;;  %v1649_v62 = vadd.f32 %v1648_v40, %v1608_v53  ;;  %v4710_v47 = vld [vmem:[#allocation5 + $0x22c] ss:$16 sps:$4 sm:$0xff]   ;;  %v4756_v40 = vld [vmem:[#allocation7 + $0x20] ss:$16 sps:$4 sm:$0xff]  }
 0x1ad   :  { %v1650_v49 = vpop.f32.mrf.mxu0  ;;  %v4716_v53 = vld [vmem:[#allocation5 + $0x3ec] ss:$16 sps:$4 sm:$0xff]  }
 0x1ae   :  { %v1651_v3 = vadd.f32 %v1650_v49, %v1610_v61  ;;  %v4713_v49 = vld [vmem:[#allocation5 + $0x20c] ss:$16 sps:$4 sm:$0xff]   ;;  %v4714_v61 = vld [vmem:[#allocation5 + $0x3e8] ss:$16 sps:$4 sm:$0xff]  }
 0x1af   :  { %2678 = vmatpush2.bf16.msra.mxu0 %v4669_v22  ;;  %v1652_v50 = vpop.f32.mrf.mxu0  ;;  %v4708_v22 = vld [vmem:[#allocation5 + $0x228] ss:$16 sps:$4 sm:$0xff]  }
 0x1b0   :  { %2679 = vmatprep.subr.bf16.mxu0 %v4677_v48  ;;  %v4761_v48 = vld [vmem:[#allocation7 + $0x4] ss:$16 sps:$4 sm:$0xff]   ;;  %v4759_v50 = vld [vmem:[#allocation7] ss:$16 sps:$4 sm:$0xff]  }
 0x1b1   :  { %v1653_v55 = vpop.f32.mrf.mxu0 }
 0x1b2   :  { %v4762_v55 = vld [vmem:[#allocation7 + $0x1e0] ss:$16 sps:$4 sm:$0xff]  }
 0x1b3   :  { %2680 = vmatpush2.bf16.msra.mxu0 %v4675_v51  ;;  %v1730_v63 = vpop.f32.mrf.mxu0  ;;  %v4711_v51 = vld [vmem:[#allocation5 + $0x208] ss:$16 sps:$4 sm:$0xff]  }
 0x1b4   :  { %v1689_v32 = vpop.f32.mrf.mxu1  ;;  %2681 = vmatprep.subr.bf16.mxu0 %v4683_v52  ;;  %v4764_v52 = vld [vmem:[#allocation7 + $0x1e4] ss:$16 sps:$4 sm:$0xff]  }
 0x1b5   :  { %v1690_v4 = vadd.f32 %v1689_v32, %v1649_v62  ;;  %v1732_v5 = vpop.f32.mrf.mxu0  ;;  %v4767_v62 = vld [vmem:[#allocation7 + $0x1c4] ss:$16 sps:$4 sm:$0xff]   ;;  %v4717_v32 = vld [vmem:[#allocation5 + $0x3c8] ss:$16 sps:$4 sm:$0xff]  }
 0x1b6   :  { %v1691_v6 = vpop.f32.mrf.mxu1 }
 0x1b7   :  { %v1731_v7 = vadd.f32 %v1730_v63, %v1690_v4  ;;  %v1692_v8 = vadd.f32 %v1691_v6, %v1651_v3  ;;  %2682 = vmatpush2.bf16.msra.mxu0 %v4681_v2  ;;  %v1734_v9 = vpop.f32.mrf.mxu0  ;;  %v4719_v63 = vld [vmem:[#allocation5 + $0x3cc] ss:$16 sps:$4 sm:$0xff]   ;;  %v4765_v2 = vld [vmem:[#allocation7 + $0x1c0] ss:$16 sps:$4 sm:$0xff]   ;;  %v4770_v3 = vld [vmem:[#allocation7 + $0x1a4] ss:$16 sps:$4 sm:$0xff]  }
 0x1b8   :  { %v1693_v10 = vpop.f32.mrf.mxu1  ;;  %3539 = vmatprep.subr.bf16.mxu0 %v4740_v58  ;;  %v4722_v4 = vld [vmem:[#allocation5 + $0x3ac] ss:$16 sps:$4 sm:$0xff]   ;;  %v4773_v6 = vld [vmem:[#allocation7 + $0x184] ss:$16 sps:$4 sm:$0xff]  }
 0x1b9   :  { %v1761_v54 = vadd.f32 %v1750_v31, %v1731_v7  ;;  %v1733_v11 = vadd.f32 %v1732_v5, %v1692_v8  ;;  %v1735_v12 = vpop.f32.mrf.mxu0  ;;  %v4768_v31 = vld [vmem:[#allocation7 + $0x1a0] ss:$16 sps:$4 sm:$0xff]   ;;  %v4720_v5 = vld [vmem:[#allocation5 + $0x3a8] ss:$16 sps:$4 sm:$0xff]   ;;  %v4725_v7 = vld [vmem:[#allocation5 + $0x38c] ss:$16 sps:$4 sm:$0xff]  }
 0x1ba   :  { %v1694_v13 = vpop.f32.mrf.mxu1  ;;  %2684 = vmatmul.mubr.bf16.vlgmr.msra.gmra.mxu0 %v5171_v20  ;;  %v4741_v20 = vld [vmem:[#allocation7 + $0xc0] ss:$16 sps:$4 sm:$0xff]   ;;  %v4728_v9 = vld [vmem:[#allocation5 + $0x36c] ss:$16 sps:$4 sm:$0xff]   ;;  %v4726_v10 = vld [vmem:[#allocation5 + $0x368] ss:$16 sps:$4 sm:$0xff]  }
 0x1bb   :  { %vm1765_vm5 = vcmp.gt.f32.partialorder %v1761_v54, 0.0  ;;  %v1769_v14 = vmul.f32 0.2, %v1761_v54  ;;  %v1762_v16 = vadd.f32 %v1754_v33, %v1733_v11  ;;  %3540 = vmatpush1.bf16.msra.mxu0 %v4738_v25  ;;  %v4771_v8 = vld [vmem:[#allocation7 + $0x180] ss:$16 sps:$4 sm:$0xff]  }
 0x1bc   :  { %3541 = vmatprep.subr.bf16.mxu0 %v4743_v28  ;;  %v4723_v33 = vld [vmem:[#allocation5 + $0x388] ss:$16 sps:$4 sm:$0xff]   ;;  %v4734_v12 = vld [vmem:[#allocation5 + $0x32c] ss:$16 sps:$4 sm:$0xff]   ;;  %v4780_v25 = vld [vmem:[#allocation7 + $0x120] ss:$16 sps:$4 sm:$0xff]  }
 0x1bd   :  { %v1770_v18 = vmul.f32 0.2, %v1762_v16  ;;  %vm1766_vm6 = vcmp.gt.f32.partialorder %v1762_v16, 0.0  ;;  %v1773_v19 = vsel %vm1765_vm5, %v1761_v54, %v1769_v14  ;;  %v4731_v54 = vld [vmem:[#allocation5 + $0x34c] ss:$16 sps:$4 sm:$0xff]  }
 0x1be   :  { %v5189_v26 = vpack.c.bf16 %v1773_v19, %v1773_v19  ;;  %v4729_v11 = vld [vmem:[#allocation5 + $0x348] ss:$16 sps:$4 sm:$0xff]   ;;  %v4737_v14 = vld [vmem:[#allocation5 + $0x30c] ss:$16 sps:$4 sm:$0xff]   ;;  %v4774_v19 = vld [vmem:[#allocation7 + $0x160] ss:$16 sps:$4 sm:$0xff]  }
 0x1bf   :  { %v1774_v21 = vsel %vm1766_vm6, %v1762_v16, %v1770_v18  ;;  %3542 = vmatpush1.bf16.msra.mxu0 %v4741_v20  ;;  %v4732_v13 = vld [vmem:[#allocation5 + $0x328] ss:$16 sps:$4 sm:$0xff]   ;;  %v4776_v18 = vld [vmem:[#allocation7 + $0x164] ss:$16 sps:$4 sm:$0xff]   ;;  %v4786_v28 = vld [vmem:[#allocation7 + $0x2e0] ss:$16 sps:$4 sm:$0xff]  }
 0x1c0   :  { %v1778_v23 = vpack.c.bf16 %v1774_v21, %v1774_v21  ;;  %3543 = vmatprep.subr.bf16.mxu0 %v4746_v34  ;;  %v4735_v16 = vld [vmem:[#allocation5 + $0x308] ss:$16 sps:$4 sm:$0xff]   ;;  %v4777_v21 = vld [vmem:[#allocation7 + $0x140] ss:$16 sps:$4 sm:$0xff]   ;;  %v4785_v58 = vld [vmem:[#allocation7 + $0x104] ss:$16 sps:$4 sm:$0xff]  }
 0x1c1   :  { %v4788_v20 = vld [vmem:[#allocation7 + $0x2e4] ss:$16 sps:$4 sm:$0xff]   ;;  %v4792_v34 = vld [vmem:[#allocation7 + $0x2c0] ss:$16 sps:$4 sm:$0xff]  }
 0x1c2   :  { %2642 = vmatprep.mubr.bf16.mxu1 %v1778_v23 }
 0x1c3   :  { %2643 = vmatmul.mubr.bf16.vlgmr.msra.gmra.mxu1 %v5189_v26  ;;  %3544 = vmatpush1.bf16.msra.mxu0 %v4744_v36  ;;  %v4800_v36 = vld [vmem:[#allocation7 + $0x2a4] ss:$16 sps:$4 sm:$0xff]  }
 0x1c4   :  { %2693 = vmatpush1.bf16.msra.mxu1 %v4690_v24  ;;  %2724 = vmatprep.mubr.bf16.mxu1 %v1778_v23  ;;  %v4779_v23 = vld [vmem:[#allocation7 + $0x144] ss:$16 sps:$4 sm:$0xff]  }
 0x1c5   :  { %2694 = vmatprep.subr.bf16.mxu1 %v4695_v27  ;;  %3545 = vmatprep.subr.bf16.mxu0 %v4749_v38  ;;  %v4782_v24 = vld [vmem:[#allocation7 + $0x124] ss:$16 sps:$4 sm:$0xff]   ;;  %v4783_v27 = vld [vmem:[#allocation7 + $0x100] ss:$16 sps:$4 sm:$0xff]  }
 0x1c6   :  { %v4806_v38 = vld [vmem:[#allocation7 + $0x284] ss:$16 sps:$4 sm:$0xff]  }
 0x1c7   :  { %3546 = vmatpush1.bf16.msra.mxu0 %v4747_v39  ;;  %v4812_v39 = vld [vmem:[#allocation7 + $0x264] ss:$16 sps:$4 sm:$0xff]  }
 0x1c8   :  { %2695 = vmatpush1.bf16.msra.mxu1 %v4693_v29  ;;  %3547 = vmatprep.subr.bf16.mxu0 %v4752_v0  ;;  %v4791_v29 = vld [vmem:[#allocation7 + $0xec] ss:$16 sps:$4 sm:$0xff]   ;;  %v4818_v0 = vld [vmem:[#allocation7 + $0x244] ss:$16 sps:$4 sm:$0xff]  }
 0x1c9   :  { %2696 = vmatprep.subr.bf16.mxu1 %v4698_v35  ;;  %v4794_v35 = vld [vmem:[#allocation7 + $0x2c4] ss:$16 sps:$4 sm:$0xff]  }
 0x1cb   :  { %3548 = vmatpush1.bf16.msra.mxu0 %v4750_v42  ;;  %v4824_v42 = vld [vmem:[#allocation7 + $0x224] ss:$16 sps:$4 sm:$0xff]  }
 0x1cc   :  { %2697 = vmatpush1.bf16.msra.mxu1 %v4696_v37  ;;  %3549 = vmatprep.subr.bf16.mxu0 %v4755_v44  ;;  %v4804_v37 = vld [vmem:[#allocation7 + $0x280] ss:$16 sps:$4 sm:$0xff]   ;;  %v4830_v44 = vld [vmem:[#allocation7 + $0x204] ss:$16 sps:$4 sm:$0xff]  }
 0x1cd   :  { %2698 = vmatprep.subr.bf16.mxu1 %v4701_v57  ;;  %v4810_v57 = vld [vmem:[#allocation7 + $0x260] ss:$16 sps:$4 sm:$0xff]  }
 0x1cf   :  { %3550 = vmatpush1.bf16.msra.mxu0 %v4753_v15  ;;  %v4836_v15 = vld [vmem:[#allocation7 + $0x3e4] ss:$16 sps:$4 sm:$0xff]  }
 0x1d0   :  { %2699 = vmatpush1.bf16.msra.mxu1 %v4699_v41  ;;  %3551 = vmatprep.subr.bf16.mxu0 %v4758_v46  ;;  %v4816_v41 = vld [vmem:[#allocation7 + $0x240] ss:$16 sps:$4 sm:$0xff]   ;;  %v4842_v46 = vld [vmem:[#allocation7 + $0x3c4] ss:$16 sps:$4 sm:$0xff]  }
 0x1d1   :  { %2700 = vmatprep.subr.bf16.mxu1 %v4704_v17  ;;  %v4822_v17 = vld [vmem:[#allocation7 + $0x220] ss:$16 sps:$4 sm:$0xff]  }
 0x1d3   :  { %3552 = vmatpush1.bf16.msra.mxu0 %v4756_v40  ;;  %v4848_v40 = vld [vmem:[#allocation7 + $0x3a4] ss:$16 sps:$4 sm:$0xff]  }
 0x1d4   :  { %2701 = vmatpush1.bf16.msra.mxu1 %v4702_v43  ;;  %3553 = vmatprep.subr.bf16.mxu0 %v4761_v48  ;;  %v4828_v43 = vld [vmem:[#allocation7 + $0x200] ss:$16 sps:$4 sm:$0xff]   ;;  %v4854_v48 = vld [vmem:[#allocation7 + $0x384] ss:$16 sps:$4 sm:$0xff]  }
 0x1d5   :  { %2702 = vmatprep.subr.bf16.mxu1 %v4707_v30  ;;  %v4834_v30 = vld [vmem:[#allocation7 + $0x3e0] ss:$16 sps:$4 sm:$0xff]  }
 0x1d7   :  { %3554 = vmatpush1.bf16.msra.mxu0 %v4759_v50  ;;  %v4858_v50 = vld [vmem:[#allocation7 + $0x360] ss:$16 sps:$4 sm:$0xff]  }
 0x1d8   :  { %2703 = vmatpush1.bf16.msra.mxu1 %v4705_v45  ;;  %3555 = vmatprep.subr.bf16.mxu0 %v4764_v52  ;;  %v4840_v45 = vld [vmem:[#allocation7 + $0x3c0] ss:$16 sps:$4 sm:$0xff]  }
 0x1d9   :  { %2704 = vmatprep.subr.bf16.mxu1 %v4710_v47  ;;  %v4846_v47 = vld [vmem:[#allocation7 + $0x3a0] ss:$16 sps:$4 sm:$0xff]  }
 0x1db   :  { %3556 = vmatpush2.bf16.msra.mxu0 %v4762_v55  ;;  %v4864_v55 = vld [vmem:[#allocation7 + $0x340] ss:$16 sps:$4 sm:$0xff]  }
 0x1dc   :  { %2705 = vmatpush1.bf16.msra.mxu1 %v4708_v22  ;;  %3557 = vmatprep.subr.bf16.mxu0 %v4767_v62  ;;  %v4852_v22 = vld [vmem:[#allocation7 + $0x380] ss:$16 sps:$4 sm:$0xff]  }
 0x1dd   :  { %2706 = vmatprep.subr.bf16.mxu1 %v4713_v49 }
 0x1df   :  { %3558 = vmatpush2.bf16.msra.mxu0 %v4765_v2  ;;  %v4870_v2 = vld [vmem:[#allocation7 + $0x320] ss:$16 sps:$4 sm:$0xff]  }
 0x1e0   :  { %2707 = vmatpush1.bf16.msra.mxu1 %v4711_v51  ;;  %3559 = vmatprep.subr.bf16.mxu0 %v4770_v3  ;;  %v4860_v51 = vld [vmem:[#allocation7 + $0x364] ss:$16 sps:$4 sm:$0xff]   ;;  %v4876_v3 = vld [vmem:[#allocation7 + $0x300] ss:$16 sps:$4 sm:$0xff]  }
 0x1e1   :  { %2708 = vmatprep.subr.bf16.mxu1 %v4716_v53 }
 0x1e3   :  { %3560 = vmatpush2.bf16.msra.mxu0 %v4768_v31 }
 0x1e4   :  { %2709 = vmatpush2.bf16.msra.mxu1 %v4714_v61  ;;  %3561 = vmatprep.subr.bf16.mxu0 %v4773_v6  ;;  %v4866_v61 = vld [vmem:[#allocation7 + $0x344] ss:$16 sps:$4 sm:$0xff]  }
 0x1e5   :  { %2710 = vmatprep.subr.bf16.mxu1 %v4719_v63  ;;  %v4872_v63 = vld [vmem:[#allocation7 + $0x324] ss:$16 sps:$4 sm:$0xff]  }
 0x1e7   :  { %3562 = vmatpush2.bf16.msra.mxu0 %v4771_v8 }
 0x1e8   :  { %2711 = vmatpush2.bf16.msra.mxu1 %v4717_v32  ;;  %3563 = vmatprep.subr.bf16.mxu0 %v4776_v18  ;;  %v4878_v32 = vld [vmem:[#allocation7 + $0x304] ss:$16 sps:$4 sm:$0xff]  }
 0x1e9   :  { %2712 = vmatprep.subr.bf16.mxu1 %v4722_v4  ;;  %v4884_v4 = vld [vmem:[#allocation7 + $0x2ec] ss:$16 sps:$4 sm:$0xff]  }
 0x1eb   :  { %3564 = vmatpush2.bf16.msra.mxu0 %v4774_v19 }
 0x1ec   :  { %2713 = vmatpush2.bf16.msra.mxu1 %v4720_v5  ;;  %3565 = vmatprep.subr.bf16.mxu0 %v4779_v23  ;;  %v5198_v5 = vld [vmem:[%s5246_s6] sm:$0xf] }
 0x1ed   :  { %2714 = vmatprep.subr.bf16.mxu1 %v4725_v7  ;;  %v1912_v7 = vrot.slane %v5198_v5, %v5153_v56 }
 0x1ef   :  { %3566 = vmatpush2.bf16.msra.mxu0 %v4777_v21 }
 0x1f0   :  { %2715 = vmatpush2.bf16.msra.mxu1 %v4723_v33  ;;  %3567 = vmatprep.subr.bf16.mxu0 %v4782_v24  ;;  %v1916_v33 = vrot.slane %v5198_v5, %v5161_v59 }
 0x1f1   :  { %2716 = vmatprep.subr.bf16.mxu1 %v4728_v9 }
 0x1f3   :  { %3568 = vmatpush2.bf16.msra.mxu0 %v4780_v25 }
 0x1f4   :  { %2717 = vmatpush2.bf16.msra.mxu1 %v4726_v10  ;;  %3569 = vmatprep.subr.bf16.mxu0 %v4785_v58  ;;  %v4789_v58 = vld [vmem:[#allocation7 + $0xe8] ss:$16 sps:$4 sm:$0xff]  }
 0x1f5   :  { %2718 = vmatprep.subr.bf16.mxu1 %v4731_v54 }
 0x1f7   :  { %3570 = vmatpush2.bf16.msra.mxu0 %v4783_v27 }
 0x1f8   :  { %2719 = vmatpush2.bf16.msra.mxu1 %v4729_v11  ;;  %3621 = vmatprep.subr.bf16.mxu0 %v4791_v29  ;;  %v4803_v29 = vld [vmem:[#allocation7 + $0xac] ss:$16 sps:$4 sm:$0xff]  }
 0x1f9   :  { %2720 = vmatprep.subr.bf16.mxu1 %v4734_v12 }
 0x1fc   :  { %2721 = vmatpush2.bf16.msra.mxu1 %v4732_v13 }
 0x1fd   :  { %2722 = vmatprep.subr.bf16.mxu1 %v4737_v14 }
 0x200   :  { %2723 = vmatpush2.bf16.msra.mxu1 %v4735_v16 }
 0x201   :  { %3580 = vmatprep.subr.bf16.mxu1 %v4788_v20  ;;  %v4795_v20 = vld [vmem:[#allocation7 + $0xc8] ss:$16 sps:$4 sm:$0xff]  }
 0x203   :  { %2725 = vmatmul.mubr.bf16.vlgmr.msra.gmra.mxu1 %v5189_v26  ;;  %v4798_v26 = vld [vmem:[#allocation7 + $0x2a0] ss:$16 sps:$4 sm:$0xff]  }
 0x204   :  { %3581 = vmatpush1.bf16.msra.mxu1 %v4786_v28  ;;  %v4797_v28 = vld [vmem:[#allocation7 + $0xcc] ss:$16 sps:$4 sm:$0xff]  }
 0x205   :  { %3582 = vmatprep.subr.bf16.mxu1 %v4794_v35  ;;  %v4809_v35 = vld [vmem:[#allocation7 + $0x8c] ss:$16 sps:$4 sm:$0xff]  }
 0x208   :  { %3583 = vmatpush1.bf16.msra.mxu1 %v4792_v34  ;;  %v4801_v34 = vld [vmem:[#allocation7 + $0xa8] ss:$16 sps:$4 sm:$0xff]  }
 0x209   :  { %3584 = vmatprep.subr.bf16.mxu1 %v4800_v36  ;;  %v4815_v36 = vld [vmem:[#allocation7 + $0x6c] ss:$16 sps:$4 sm:$0xff]  }
 0x20c   :  { %3585 = vmatpush1.bf16.msra.mxu1 %v4798_v26  ;;  %v4807_v26 = vld [vmem:[#allocation7 + $0x88] ss:$16 sps:$4 sm:$0xff]  }
 0x20d   :  { %3586 = vmatprep.subr.bf16.mxu1 %v4806_v38  ;;  %v4821_v38 = vld [vmem:[#allocation7 + $0x4c] ss:$16 sps:$4 sm:$0xff]  }
 0x210   :  { %3587 = vmatpush1.bf16.msra.mxu1 %v4804_v37  ;;  %v4813_v37 = vld [vmem:[#allocation7 + $0x68] ss:$16 sps:$4 sm:$0xff]  }
 0x211   :  { %3588 = vmatprep.subr.bf16.mxu1 %v4812_v39  ;;  %v4827_v39 = vld [vmem:[#allocation7 + $0x2c] ss:$16 sps:$4 sm:$0xff]  }
 0x214   :  { %3589 = vmatpush1.bf16.msra.mxu1 %v4810_v57  ;;  %v4819_v57 = vld [vmem:[#allocation7 + $0x48] ss:$16 sps:$4 sm:$0xff]  }
 0x215   :  { %3590 = vmatprep.subr.bf16.mxu1 %v4818_v0  ;;  %v4833_v0 = vld [vmem:[#allocation7 + $0xc] ss:$16 sps:$4 sm:$0xff]  }
 0x218   :  { %3591 = vmatpush1.bf16.msra.mxu1 %v4816_v41  ;;  %v4825_v41 = vld [vmem:[#allocation7 + $0x28] ss:$16 sps:$4 sm:$0xff]  }
 0x219   :  { %3592 = vmatprep.subr.bf16.mxu1 %v4824_v42  ;;  %v4839_v42 = vld [vmem:[#allocation7 + $0x1ec] ss:$16 sps:$4 sm:$0xff]  }
 0x21c   :  { %3593 = vmatpush1.bf16.msra.mxu1 %v4822_v17  ;;  %v4831_v17 = vld [vmem:[#allocation7 + $0x8] ss:$16 sps:$4 sm:$0xff]  }
 0x21d   :  { %3594 = vmatprep.subr.bf16.mxu1 %v4830_v44  ;;  %v4845_v44 = vld [vmem:[#allocation7 + $0x1cc] ss:$16 sps:$4 sm:$0xff]  }
 0x220   :  { %3595 = vmatpush1.bf16.msra.mxu1 %v4828_v43  ;;  %v4837_v43 = vld [vmem:[#allocation7 + $0x1e8] ss:$16 sps:$4 sm:$0xff]  }
 0x221   :  { %3596 = vmatprep.subr.bf16.mxu1 %v4836_v15  ;;  %v4851_v15 = vld [vmem:[#allocation7 + $0x1ac] ss:$16 sps:$4 sm:$0xff]  }
 0x224   :  { %3597 = vmatpush2.bf16.msra.mxu1 %v4834_v30  ;;  %v4843_v30 = vld [vmem:[#allocation7 + $0x1c8] ss:$16 sps:$4 sm:$0xff]  }
 0x225   :  { %3598 = vmatprep.subr.bf16.mxu1 %v4842_v46  ;;  %v4857_v46 = vld [vmem:[#allocation7 + $0x18c] ss:$16 sps:$4 sm:$0xff]  }
 0x228   :  { %3599 = vmatpush2.bf16.msra.mxu1 %v4840_v45  ;;  %v4849_v45 = vld [vmem:[#allocation7 + $0x1a8] ss:$16 sps:$4 sm:$0xff]  }
 0x229   :  { %3600 = vmatprep.subr.bf16.mxu1 %v4848_v40  ;;  %v4863_v40 = vld [vmem:[#allocation7 + $0x16c] ss:$16 sps:$4 sm:$0xff]  }
 0x22c   :  { %3601 = vmatpush2.bf16.msra.mxu1 %v4846_v47  ;;  %v4855_v47 = vld [vmem:[#allocation7 + $0x188] ss:$16 sps:$4 sm:$0xff]  }
 0x22d   :  { %3602 = vmatprep.subr.bf16.mxu1 %v4854_v48  ;;  %v4869_v48 = vld [vmem:[#allocation7 + $0x14c] ss:$16 sps:$4 sm:$0xff]  }
 0x230   :  { %3603 = vmatpush2.bf16.msra.mxu1 %v4852_v22  ;;  %v4861_v22 = vld [vmem:[#allocation7 + $0x168] ss:$16 sps:$4 sm:$0xff]  }
 0x231   :  { %3604 = vmatprep.subr.bf16.mxu1 %v4860_v51  ;;  %v1924_v51 = vrot.slane %v5198_v5, %v5182_v1 }
 0x234   :  { %3605 = vmatpush2.bf16.msra.mxu1 %v4858_v50  ;;  %v4867_v50 = vld [vmem:[#allocation7 + $0x148] ss:$16 sps:$4 sm:$0xff]  }
 0x235   :  { %3606 = vmatprep.subr.bf16.mxu1 %v4866_v61  ;;  %v4873_v61 = vld [vmem:[#allocation7 + $0x128] ss:$16 sps:$4 sm:$0xff]  }
 0x238   :  { %3607 = vmatpush2.bf16.msra.mxu1 %v4864_v55 }
 0x239   :  { %3608 = vmatprep.subr.bf16.mxu1 %v4872_v63 }
 0x23a   :  { %v2603_v49 = vpop.f32.mrf.mxu0 }
 0x23b   :  { %v2604_v10 = vadd.f32 %v2603_v49, %v1912_v7  ;;  %v1920_v49 = vrot.slane %v5198_v5, %v5177_v60 }
 0x23c   :  { %v2605_v52 = vpop.f32.mrf.mxu0  ;;  %3609 = vmatpush2.bf16.msra.mxu1 %v4870_v2  ;;  %v4881_v2 = vld [vmem:[#allocation7 + $0x10c] ss:$16 sps:$4 sm:$0xff]  }
 0x23d   :  { %3610 = vmatprep.subr.bf16.mxu1 %v4878_v32  ;;  %v2606_v11 = vadd.f32 %v2605_v52, %v1916_v33  ;;  %v4875_v52 = vld [vmem:[#allocation7 + $0x12c] ss:$16 sps:$4 sm:$0xff]  }
 0x23e   :  { %v2607_v53 = vpop.f32.mrf.mxu0 }
 0x240   :  { %v2608_v62 = vpop.f32.mrf.mxu0  ;;  %3611 = vmatpush2.bf16.msra.mxu1 %v4876_v3 }
 0x241   :  { %3662 = vmatprep.subr.bf16.mxu1 %v4884_v4 }
 0x27a   :  { %v5193_v31 = vpop.f32.mrf.mxu0 }
 0x27b   :  { %v2686_v53 = vadd.f32 %v5193_v31, %v1920_v49 }
 0x27c   :  { %v5200_v6 = vpop.f32.mrf.mxu0 }
 0x27d   :  { %v2688_v62 = vadd.f32 %v5200_v6, %v1924_v51 }
 0x27e   :  { %v2689_v8 = vpop.f32.mrf.mxu0 }
 0x27f   :  { %v4879_v8 = vld [vmem:[#allocation7 + $0x108] ss:$16 sps:$4 sm:$0xff]  }
 0x280   :  { %v2690_v9 = vpop.f32.mrf.mxu0 }
 0x283   :  { %v2644_v54 = vpop.f32.mrf.mxu1 }
 0x284   :  { %v2645_v12 = vadd.f32 %v2644_v54, %v2604_v10  ;;  %v4882_v54 = vld [vmem:[#allocation7 + $0x2e8] ss:$16 sps:$4 sm:$0xff]  }
 0x285   :  { %v2646_v13 = vpop.f32.mrf.mxu1 }
 0x286   :  { %vm2733_vm7 = vcmp.gt.f32.partialorder %v2645_v12, 0.0  ;;  %v2737_v14 = vmul.f32 0.2, %v2645_v12  ;;  %v2647_v16 = vadd.f32 %v2646_v13, %v2606_v11  ;;  %v4887_v11 = vld [vmem:[#allocation7 + $0x2cc] ss:$16 sps:$4 sm:$0xff]  }
 0x287   :  { %v2648_v18 = vpop.f32.mrf.mxu1  ;;  %v4890_v13 = vld [vmem:[#allocation7 + $0x2ac] ss:$16 sps:$4 sm:$0xff]  }
 0x288   :  { %vm2734_vm8 = vcmp.gt.f32.partialorder %v2647_v16, 0.0  ;;  %v2738_v19 = vmul.f32 0.2, %v2647_v16  ;;  %v2741_v21 = vsel %vm2733_vm7, %v2645_v12, %v2737_v14  ;;  %v4885_v12 = vld [vmem:[#allocation7 + $0x2c8] ss:$16 sps:$4 sm:$0xff]  }
 0x289   :  { %v2649_v23 = vpop.f32.mrf.mxu1  ;;  %v5206_v27 = vpack.c.bf16 %v2741_v21, %v2741_v21  ;;  %v4888_v14 = vld [vmem:[#allocation7 + $0x2a8] ss:$16 sps:$4 sm:$0xff]  }
 0x28a   :  { %v2742_v24 = vsel %vm2734_vm8, %v2647_v16, %v2738_v19  ;;  %v4893_v16 = vld [vmem:[#allocation7 + $0x28c] ss:$16 sps:$4 sm:$0xff]   ;;  %v4891_v18 = vld [vmem:[#allocation7 + $0x288] ss:$16 sps:$4 sm:$0xff]  }
 0x28b   :  { %v2746_v25 = vpack.c.bf16 %v2742_v24, %v2742_v24  ;;  %v4896_v19 = vld [vmem:[#allocation7 + $0x26c] ss:$16 sps:$4 sm:$0xff]   ;;  %v4894_v21 = vld [vmem:[#allocation7 + $0x268] ss:$16 sps:$4 sm:$0xff]  }
 0x28c   :  { %v4899_v23 = vld [vmem:[#allocation7 + $0x24c] ss:$16 sps:$4 sm:$0xff]   ;;  %v4897_v24 = vld [vmem:[#allocation7 + $0x248] ss:$16 sps:$4 sm:$0xff]  }
 0x28d   :  { %3571 = vmatprep.mubr.bf16.mxu0 %v2746_v25 }
 0x28e   :  { %3572 = vmatmul.mubr.bf16.vlgmr.msra.gmra.mxu0 %v5206_v27 }
 0x28f   :  { %3622 = vmatpush1.bf16.msra.mxu0 %v4789_v58  ;;  %3653 = vmatprep.mubr.bf16.mxu0 %v2746_v25  ;;  %v4902_v25 = vld [vmem:[#allocation7 + $0x22c] ss:$16 sps:$4 sm:$0xff]   ;;  %v4900_v58 = vld [vmem:[#allocation7 + $0x228] ss:$16 sps:$4 sm:$0xff]  }
 0x290   :  { %3623 = vmatprep.subr.bf16.mxu0 %v4797_v28  ;;  %v4903_v28 = vld [vmem:[#allocation7 + $0x208] ss:$16 sps:$4 sm:$0xff]  }
 0x293   :  { %3624 = vmatpush1.bf16.msra.mxu0 %v4795_v20  ;;  %v4908_v20 = vld [vmem:[#allocation7 + $0x3ec] ss:$16 sps:$4 sm:$0xff]  }
 0x294   :  { %3625 = vmatprep.subr.bf16.mxu0 %v4803_v29  ;;  %v4906_v29 = vld [vmem:[#allocation7 + $0x3e8] ss:$16 sps:$4 sm:$0xff]  }
 0x297   :  { %3626 = vmatpush1.bf16.msra.mxu0 %v4801_v34  ;;  %v4911_v34 = vld [vmem:[#allocation7 + $0x3cc] ss:$16 sps:$4 sm:$0xff]  }
 0x298   :  { %3627 = vmatprep.subr.bf16.mxu0 %v4809_v35  ;;  %v4909_v35 = vld [vmem:[#allocation7 + $0x3c8] ss:$16 sps:$4 sm:$0xff]  }
 0x29b   :  { %3628 = vmatpush1.bf16.msra.mxu0 %v4807_v26  ;;  %v4914_v26 = vld [vmem:[#allocation7 + $0x3ac] ss:$16 sps:$4 sm:$0xff]  }
 0x29c   :  { %3629 = vmatprep.subr.bf16.mxu0 %v4815_v36  ;;  %v4912_v36 = vld [vmem:[#allocation7 + $0x3a8] ss:$16 sps:$4 sm:$0xff]  }
 0x29f   :  { %3630 = vmatpush1.bf16.msra.mxu0 %v4813_v37  ;;  %v4917_v37 = vld [vmem:[#allocation7 + $0x38c] ss:$16 sps:$4 sm:$0xff]  }
 0x2a0   :  { %3631 = vmatprep.subr.bf16.mxu0 %v4821_v38  ;;  %v4915_v38 = vld [vmem:[#allocation7 + $0x388] ss:$16 sps:$4 sm:$0xff]  }
 0x2a3   :  { %3632 = vmatpush1.bf16.msra.mxu0 %v4819_v57  ;;  %v4920_v57 = vld [vmem:[#allocation7 + $0x36c] ss:$16 sps:$4 sm:$0xff]  }
 0x2a4   :  { %3633 = vmatprep.subr.bf16.mxu0 %v4827_v39  ;;  %v4918_v39 = vld [vmem:[#allocation7 + $0x368] ss:$16 sps:$4 sm:$0xff]  }
 0x2a7   :  { %3634 = vmatpush1.bf16.msra.mxu0 %v4825_v41  ;;  %v4923_v41 = vld [vmem:[#allocation7 + $0x34c] ss:$16 sps:$4 sm:$0xff]  }
 0x2a8   :  { %3635 = vmatprep.subr.bf16.mxu0 %v4833_v0  ;;  %v4921_v0 = vld [vmem:[#allocation7 + $0x348] ss:$16 sps:$4 sm:$0xff]  }
 0x2ab   :  { %3636 = vmatpush1.bf16.msra.mxu0 %v4831_v17  ;;  %v4926_v17 = vld [vmem:[#allocation7 + $0x32c] ss:$16 sps:$4 sm:$0xff]  }
 0x2ac   :  { %3637 = vmatprep.subr.bf16.mxu0 %v4839_v42  ;;  %v4924_v42 = vld [vmem:[#allocation7 + $0x328] ss:$16 sps:$4 sm:$0xff]  }
 0x2af   :  { %3638 = vmatpush2.bf16.msra.mxu0 %v4837_v43  ;;  %v4929_v43 = vld [vmem:[#allocation7 + $0x30c] ss:$16 sps:$4 sm:$0xff]  }
 0x2b0   :  { %3639 = vmatprep.subr.bf16.mxu0 %v4845_v44  ;;  %v4927_v44 = vld [vmem:[#allocation7 + $0x308] ss:$16 sps:$4 sm:$0xff]  }
 0x2b3   :  { %3640 = vmatpush2.bf16.msra.mxu0 %v4843_v30 }
 0x2b4   :  { %3641 = vmatprep.subr.bf16.mxu0 %v4851_v15 }
 0x2b7   :  { %3642 = vmatpush2.bf16.msra.mxu0 %v4849_v45 }
 0x2b8   :  { %3643 = vmatprep.subr.bf16.mxu0 %v4857_v46 }
 0x2bb   :  { %3644 = vmatpush2.bf16.msra.mxu0 %v4855_v47  ;;  %v2877_v47 = vld [vmem:[%s5248_s8] sm:$0xf] }
 0x2bc   :  { %3645 = vmatprep.subr.bf16.mxu0 %v4863_v40  ;;  %v2882_v40 = vrot.slane %v2877_v47, %v5153_v56 }
 0x2bf   :  { %3646 = vmatpush2.bf16.msra.mxu0 %v4861_v22  ;;  %v2886_v22 = vrot.slane %v2877_v47, %v5161_v59 }
 0x2c0   :  { %3647 = vmatprep.subr.bf16.mxu0 %v4869_v48 }
 0x2c3   :  { %v2726_v55 = vpop.f32.mrf.mxu1  ;;  %3648 = vmatpush2.bf16.msra.mxu0 %v4867_v50 }
 0x2c4   :  { %v2727_v63 = vadd.f32 %v2726_v55, %v2686_v53  ;;  %3649 = vmatprep.subr.bf16.mxu0 %v4875_v52  ;;  %v3715_v53 = vld [vmem:[%s5249_s9] sm:$0xf] }
 0x2c5   :  { %v2728_v32 = vpop.f32.mrf.mxu1 }
 0x2c6   :  { %vm2735_vm9 = vcmp.gt.f32.partialorder %v2727_v63, 0.0  ;;  %v2739_v3 = vmul.f32 0.2, %v2727_v63  ;;  %v2729_v4 = vadd.f32 %v2728_v32, %v2688_v62 }
 0x2c7   :  { %v2730_v7 = vpop.f32.mrf.mxu1  ;;  %3650 = vmatpush2.bf16.msra.mxu0 %v4873_v61 }
 0x2c8   :  { %vm2736_vm10 = vcmp.gt.f32.partialorder %v2729_v4, 0.0  ;;  %v2740_v5 = vmul.f32 0.2, %v2729_v4  ;;  %3651 = vmatprep.subr.bf16.mxu0 %v4881_v2  ;;  %v2743_v33 = vsel %vm2735_vm9, %v2727_v63, %v2739_v3  ;;  %v3720_v3 = vrot.slane %v3715_v53, %v5153_v56 }
 0x2c9   :  { %v2731_v31 = vpop.f32.mrf.mxu1  ;;  %v5215_v6 = vpack.c.bf16 %v2743_v33, %v2743_v33 }
 0x2ca   :  { %v2744_v9 = vsel %vm2736_vm10, %v2729_v4, %v2740_v5  ;;  %v3724_v4 = vrot.slane %v3715_v53, %v5161_v59  ;;  %v3728_v59 = vrot.slane %v3715_v53, %v5177_v60 }
 0x2cb   :  { %3652 = vmatpush2.bf16.msra.mxu0 %v4879_v8  ;;  %v2748_v10 = vpack.c.bf16 %v2744_v9, %v2744_v9 }
 0x2cd   :  { %3612 = vmatprep.mubr.bf16.mxu1 %v2748_v10 }
 0x2ce   :  { %3613 = vmatmul.mubr.bf16.vlgmr.msra.gmra.mxu1 %v5215_v6  ;;  %3654 = vmatmul.mubr.bf16.vlgmr.msra.gmra.mxu0 %v5206_v27  ;;  %v4905_v27 = vld [vmem:[#allocation7 + $0x20c] ss:$16 sps:$4 sm:$0xff]  }
 0x2cf   :  { %3663 = vmatpush1.bf16.msra.mxu1 %v4882_v54  ;;  %3694 = vmatprep.mubr.bf16.mxu1 %v2748_v10 }
 0x2d0   :  { %3664 = vmatprep.subr.bf16.mxu1 %v4887_v11  ;;  %v2894_v11 = vrot.slane %v2877_v47, %v5182_v1 }
 0x2d3   :  { %3665 = vmatpush1.bf16.msra.mxu1 %v4885_v12 }
 0x2d4   :  { %3666 = vmatprep.subr.bf16.mxu1 %v4890_v13 }
 0x2d7   :  { %3667 = vmatpush1.bf16.msra.mxu1 %v4888_v14 }
 0x2d8   :  { %3668 = vmatprep.subr.bf16.mxu1 %v4893_v16 }
 0x2db   :  { %3669 = vmatpush1.bf16.msra.mxu1 %v4891_v18 }
 0x2dc   :  { %3670 = vmatprep.subr.bf16.mxu1 %v4896_v19 }
 0x2df   :  { %3671 = vmatpush1.bf16.msra.mxu1 %v4894_v21 }
 0x2e0   :  { %3672 = vmatprep.subr.bf16.mxu1 %v4899_v23  ;;  %v3732_v23 = vrot.slane %v3715_v53, %v5182_v1 }
 0x2e3   :  { %3673 = vmatpush1.bf16.msra.mxu1 %v4897_v24 }
 0x2e4   :  { %3674 = vmatprep.subr.bf16.mxu1 %v4902_v25 }
 0x2e7   :  { %3675 = vmatpush1.bf16.msra.mxu1 %v4900_v58 }
 0x2e8   :  { %3676 = vmatprep.subr.bf16.mxu1 %v4905_v27 }
 0x2eb   :  { %3677 = vmatpush1.bf16.msra.mxu1 %v4903_v28 }
 0x2ec   :  { %3678 = vmatprep.subr.bf16.mxu1 %v4908_v20 }
 0x2ef   :  { %3679 = vmatpush2.bf16.msra.mxu1 %v4906_v29 }
 0x2f0   :  { %3680 = vmatprep.subr.bf16.mxu1 %v4911_v34 }
 0x2f3   :  { %3681 = vmatpush2.bf16.msra.mxu1 %v4909_v35 }
 0x2f4   :  { %3682 = vmatprep.subr.bf16.mxu1 %v4914_v26 }
 0x2f7   :  { %3683 = vmatpush2.bf16.msra.mxu1 %v4912_v36 }
 0x2f8   :  { %3684 = vmatprep.subr.bf16.mxu1 %v4917_v37 }
 0x2fb   :  { %3685 = vmatpush2.bf16.msra.mxu1 %v4915_v38 }
 0x2fc   :  { %3686 = vmatprep.subr.bf16.mxu1 %v4920_v57 }
 0x2ff   :  { %3687 = vmatpush2.bf16.msra.mxu1 %v4918_v39 }
 0x300   :  { %3688 = vmatprep.subr.bf16.mxu1 %v4923_v41 }
 0x303   :  { %3689 = vmatpush2.bf16.msra.mxu1 %v4921_v0 }
 0x304   :  { %3690 = vmatprep.subr.bf16.mxu1 %v4926_v17 }
 0x307   :  { %3691 = vmatpush2.bf16.msra.mxu1 %v4924_v42 }
 0x308   :  { %3692 = vmatprep.subr.bf16.mxu1 %v4929_v43 }
 0x30b   :  { %3693 = vmatpush2.bf16.msra.mxu1 %v4927_v44 }
 0x30e   :  { %3695 = vmatmul.mubr.bf16.vlgmr.msra.gmra.mxu1 %v5215_v6  ;;  %v2890_v6 = vrot.slane %v2877_v47, %v5177_v60  ;;  %v3747_v60 = vstv %s5250_s10 }
 0x34e   :  { %v3573_v30 = vpop.f32.mrf.mxu0 }
 0x34f   :  { %v3574_v48 = vadd.f32 %v3573_v30, %v2882_v40 }
 0x350   :  { %v3575_v15 = vpop.f32.mrf.mxu0 }
 0x351   :  { %v3576_v51 = vadd.f32 %v3575_v15, %v2886_v22 }
 0x352   :  { %v3577_v45 = vpop.f32.mrf.mxu0 }
 0x354   :  { %v3578_v46 = vpop.f32.mrf.mxu0 }
 0x38e   :  { %v3614_v49 = vpop.f32.mrf.mxu1  ;;  %v3655_v50 = vpop.f32.mrf.mxu0 }
 0x38f   :  { %v3615_v52 = vadd.f32 %v3614_v49, %v3574_v48  ;;  %v3656_v12 = vadd.f32 %v3655_v50, %v2890_v6 }
 0x390   :  { %v3616_v55 = vpop.f32.mrf.mxu1  ;;  %v3657_v61 = vpop.f32.mrf.mxu0 }
 0x391   :  { %vm3703_vm11 = vcmp.gt.f32.partialorder %v3615_v52, 0.0  ;;  %v3707_v62 = vmul.f32 0.2, %v3615_v52  ;;  %v3617_v63 = vadd.f32 %v3616_v55, %v3576_v51  ;;  %v3658_v14 = vadd.f32 %v3657_v61, %v2894_v11 }
 0x392   :  { %v3618_v2 = vpop.f32.mrf.mxu1  ;;  %v3659_v32 = vpop.f32.mrf.mxu0 }
 0x393   :  { %v3711_v7 = vsel %vm3703_vm11, %v3615_v52, %v3707_v62  ;;  %vm3704_vm12 = vcmp.gt.f32.partialorder %v3617_v63, 0.0  ;;  %v3708_v8 = vmul.f32 0.2, %v3617_v63 }
 0x394   :  { %v3619_v5 = vpop.f32.mrf.mxu1  ;;  %v3660_v33 = vpop.f32.mrf.mxu0  ;;  %v3737_v9 = vmul.f32 %v3720_v3, %v3711_v7 }
 0x395   :  { %v3712_v31 = vsel %vm3704_vm12, %v3617_v63, %v3708_v8 }
 0x396   :  { %v3738_v10 = vmul.f32 %v3724_v4, %v3712_v31 }
 0x398   :  { %v3741_v54 = vadd.f32 %v3738_v10, %v3737_v9 }
 0x3ce   :  { %v3696_v13 = vpop.f32.mrf.mxu1 }
 0x3cf   :  { %v3697_v16 = vadd.f32 %v3696_v13, %v3656_v12 }
 0x3d0   :  { %v3698_v56 = vpop.f32.mrf.mxu1 }
 0x3d1   :  { %vm3705_vm13 = vcmp.gt.f32.partialorder %v3697_v16, 0.0  ;;  %v3709_v18 = vmul.f32 0.2, %v3697_v16  ;;  %v3699_v19 = vadd.f32 %v3698_v56, %v3658_v14 }
 0x3d2   :  { %v3700_v21 = vpop.f32.mrf.mxu1 }
 0x3d3   :  { %vm3706_vm14 = vcmp.gt.f32.partialorder %v3699_v19, 0.0  ;;  %v3710_v24 = vmul.f32 0.2, %v3699_v19  ;;  %v3713_v25 = vsel %vm3705_vm13, %v3697_v16, %v3709_v18 }
 0x3d4   :  { %v3701_v58 = vpop.f32.mrf.mxu1  ;;  %v3739_v27 = vmul.f32 %v3728_v59, %v3713_v25 }
 0x3d5   :  { %v3714_v28 = vsel %vm3706_vm14, %v3699_v19, %v3710_v24 }
 0x3d6   :  { %v3740_v20 = vmul.f32 %v3732_v23, %v3714_v28  ;;  %v3742_v29 = vadd.f32 %v3741_v54, %v3739_v27 }
 0x3d8   :  { %v3743_v34 = vadd.f32 %v3742_v29, %v3740_v20 }
 0x3da   :  { %3744 = vadd.xlane.f32.xlu0 %v3743_v34 }
 0x463   :  { %v3745_v35 = vpop.xlane.xlu0 %3744 }
 0x464   :  { %v3748_v26 = vadd.f32 %v3747_v60, %v3745_v35 }
 0x466   :  { %v4232_v36 = vmul.f32 -1.442695, %v3748_v26 }
 0x468   :  { %4930 = vpow2.f32 %v4232_v36 }
 0x475   :  { %v4931_v37 = vpop.eup %4930 }
 0x476   :  { %v3752_v1 = vadd.f32 1.0, %v4931_v37 }
 0x478   :  { %4932 = vrcp.f32 %v3752_v1 }
 0x485   :  { %v4933_v38 = vpop.eup %4932 }
 0x486   :  { %3756 = vst.msk [vmem:[%s5251_s11] sm:$0xff] %vm3755_vm15, %v4933_v38 }
 0x487   :  { %3761 = vsyncpa [#allocation4], 1 }
 0x488   :  { %3762 = vsyncpa [#allocation6], 1 }

</bundles_post_ra>
